<compile_context>
chip_gen: v7x
topology: tpu7x:2x2x1
jax: 0.10.0
libtpu: 0.0.40
codegen_flags: <defaults>
</compile_context>

<pallas_src>
import functools
import math

import jax
import jax.numpy as jnp
from jax.experimental import pallas as pl
from jax.experimental.pallas import tpu as pltpu


def _mha_kernel(q_ref, k_ref, v_ref,
                wq_ref, bq_ref, wk_ref, bk_ref, wv_ref, bv_ref,
                wo_ref, bo_ref,
                *rest,
                heads_per_group, head_dim, compute_dtype):
    """One grid step = (batch block b) x (head group g).

    q/k/v refs: (BB, S, E).  wq/wk/wv refs: (E, Gd) column slices (pre-
    transposed, scale folded into wq/bq).  bq/bk/bv: (1, Gd).  wo: (Gd, E) row
    slice.  bo: (1, E).  out_ref: (BB, S, E) (written on last group step).
    attn_ref (optional): (BB, Gh, S, S).  Scratch: ctx (BB*S, Gd) f32 and the
    output-projection accumulator acc (BB*S, E) f32.
    """
    if len(rest) == 4:
        out_ref, attn_ref, ctx_ref, acc_ref = rest
    else:
        out_ref, ctx_ref, acc_ref = rest
        attn_ref = None

    BB, S, E = q_ref.shape
    Gh, Dh = heads_per_group, head_dim
    g = pl.program_id(1)

    def mxu(x):
        # Optional bf16 cast for MXU operands (f32 accumulation kept below).
        return x if compute_dtype is None else x.astype(compute_dtype)

    @pl.when(g == 0)
    def _():
        acc_ref[...] = jnp.zeros_like(acc_ref)

    xq = q_ref[...].reshape(BB * S, E)
    xk = k_ref[...].reshape(BB * S, E)
    xv = v_ref[...].reshape(BB * S, E)

    # Projections for this head group only: (BB*S, E) @ (E, Gd).
    q = jnp.dot(mxu(xq), mxu(wq_ref[...]),
                preferred_element_type=jnp.float32) + bq_ref[...]
    k = jnp.dot(mxu(xk), mxu(wk_ref[...]),
                preferred_element_type=jnp.float32) + bk_ref[...]
    v = jnp.dot(mxu(xv), mxu(wv_ref[...]),
                preferred_element_type=jnp.float32) + bv_ref[...]

    # Per-head attention inside the group.  Gh is small by construction
    # (smallest divisor of H with Gh*Dh lane-aligned, e.g. 1 for Dh=128,
    # 2 for Dh=64), so the static unroll keeps few (BB,S,S) temps live.
    for h in range(Gh):
        lo = h * Dh
        qh = q[:, lo:lo + Dh].reshape(BB, S, Dh)
        kh = k[:, lo:lo + Dh].reshape(BB, S, Dh)
        vh = v[:, lo:lo + Dh].reshape(BB, S, Dh)

        # (BB, S, S) scores; contraction over last dims (no K transpose).
        s = jnp.einsum('bqd,bkd->bqk', mxu(qh), mxu(kh),
                       preferred_element_type=jnp.float32)
        s = s - jnp.max(s, axis=-1, keepdims=True)
        p = jnp.exp(s)
        inv = 1.0 / jnp.sum(p, axis=-1, keepdims=True)   # exact: rows sum to 1
        p = p * inv

        if attn_ref is not None:
            attn_ref[:, h, :, :] = p.astype(attn_ref.dtype)

        ctx_h = jnp.einsum('bqk,bkd->bqd', mxu(p), mxu(vh),
                           preferred_element_type=jnp.float32)    # (BB, S, Dh)
        ctx_ref[:, lo:lo + Dh] = ctx_h.reshape(BB * S, Dh)

    # Partial output projection for this head group, accumulated across groups.
    acc_ref[...] += jnp.dot(mxu(ctx_ref[...]), mxu(wo_ref[...]),
                            preferred_element_type=jnp.float32)

    @pl.when(g == pl.num_programs(1) - 1)
    def _():
        out = acc_ref[...] + bo_ref[...]
        out_ref[...] = out.reshape(BB, S, E).astype(out_ref.dtype)


def _pick_head_group(num_heads, head_dim):
    # Smallest head group whose combined width (Gh*Dh) is a multiple of 128 so
    # the sliced weight BlockSpecs and per-group stores are lane-dense; fall
    # back to all heads (Gd == E: full-dim blocks, always BlockSpec-legal).
    for g in range(1, num_heads + 1):
        if num_heads % g == 0 and (g * head_dim) % 128 == 0:
            return g
    return num_heads


def _vmem_bytes_estimate(block_b, S, E, Gh, Dh, itemsize=4):
    Gd = Gh * Dh
    x_blk = block_b * S * E * itemsize                    # one (BB,S,E) block
    attn_blk = block_b * Gh * S * S * itemsize            # one attn block
    w_blk = (3 * E * Gd + Gd * E + 3 * Gd + E) * itemsize # sliced weights+biases
    proj = 3 * block_b * S * Gd * 4                       # q/k/v projections (f32)
    scores = 3 * block_b * S * S * 4                      # live s/exp/p per head
    ctx = block_b * S * Gd * 4                            # ctx scratch
    acc = block_b * S * E * 4                              # accumulator scratch
    # 3 inputs + out + attn + weight slices double-buffered by the pipeline,
    # plus single-buffered scratch / in-kernel intermediates and slack.
    return 2 * (4 * x_blk + attn_blk + w_blk) + proj + scores + ctx + acc + x_blk


def _vmem_capacity_bytes():
    try:
        info = pltpu.get_tpu_info()
        cap = getattr(info, "vmem_capacity_bytes", None)
        if cap:
            return int(cap)
    except Exception:
        pass
    return 64 * 2**20   # conservative fallback (v7x-sized)


def _pick_block_b(B, S, E, Gh, Dh, budget_bytes):
    # Cap at B//2 so the "parallel" batch axis has >=2 grid steps (v7x: 2 TCs).
    max_bb = max(1, B // 2)
    feasible = []
    for bb in range(1, max_bb + 1):
        if B % bb:
            continue
        if bb > 1 and S % 8:
            continue   # keep (BB,S,E) <-> (BB*S,E) reshapes layout-trivial
        if _vmem_bytes_estimate(bb, S, E, Gh, Dh) <= budget_bytes:
            feasible.append(bb)
    if not feasible:
        return 1
    # v6e/v7x MXUs are 256-wide/deep: prefer BB*S multiples of 256 when possible.
    aligned = [bb for bb in feasible if (bb * S) % 256 == 0]
    return max(aligned) if aligned else max(feasible)


def multi_head_attention(query, key, value, params, *, num_heads,
                         block_b=None, return_attn_weights=True,
                         attn_dtype=jnp.float32, compute_dtype=None):
    """query/key/value: (B, S, E).  params: dict of wq,bq,wk,bk,wv,bv,wo,bo.

    return_attn_weights=False drops the (B,H,S,S) output (dominant HBM traffic
    at real S).  attn_dtype=jnp.bfloat16 halves its writeback when kept.
    compute_dtype=jnp.bfloat16 casts MXU operands to bf16 (f32 accumulation).
    """
    B, S, E = query.shape
    head_dim = E // num_heads
    assert head_dim * num_heads == E

    # Host-side layout plumbing (free): pre-transpose weights to (in, out) and
    # fold the 1/sqrt(head_dim) score scale into the query projection.
    scale = 1.0 / math.sqrt(head_dim)
    wq_t = (params["wq"] * scale).T
    bq_s = (params["bq"] * scale).reshape(1, E)
    wk_t = params["wk"].T
    bk = params["bk"].reshape(1, E)
    wv_t = params["wv"].T
    bv = params["bv"].reshape(1, E)
    wo_t = params["wo"].T
    bo = params["bo"].reshape(1, E)
    if compute_dtype is not None:
        wq_t, wk_t, wv_t, wo_t = (w.astype(compute_dtype)
                                  for w in (wq_t, wk_t, wv_t, wo_t))

    Gh = _pick_head_group(num_heads, head_dim)
    Gd = Gh * head_dim
    n_groups = num_heads // Gh

    # Generation-aware VMEM budget: ~96 MiB on v5e/v6e, ~48 MiB on v7x.
    cap = _vmem_capacity_bytes()
    budget = (cap * 3) // 4
    if block_b is None:
        block_b = _pick_block_b(B, S, E, Gh, head_dim, budget)
    assert B % block_b == 0
    est = _vmem_bytes_estimate(block_b, S, E, Gh, head_dim)
    vmem_limit = int(min(max(budget, est + (8 << 20)), cap - (4 << 20)))

    x_spec = pl.BlockSpec((block_b, S, E), lambda b, g: (b, 0, 0))
    wcol_spec = pl.BlockSpec((E, Gd), lambda b, g: (0, g))    # head-group columns
    bcol_spec = pl.BlockSpec((1, Gd), lambda b, g: (0, g))
    wo_spec = pl.BlockSpec((Gd, E), lambda b, g: (g, 0))      # head-group rows
    bo_spec = pl.BlockSpec((1, E), lambda b, g: (0, 0))
    out_spec = pl.BlockSpec((block_b, S, E), lambda b, g: (b, 0, 0))

    out_shape = [jax.ShapeDtypeStruct((B, S, E), query.dtype)]
    out_specs = [out_spec]
    if return_attn_weights:
        out_shape.append(jax.ShapeDtypeStruct((B, num_heads, S, S), attn_dtype))
        out_specs.append(
            pl.BlockSpec((block_b, Gh, S, S), lambda b, g: (b, g, 0, 0)))

    kernel = functools.partial(_mha_kernel, heads_per_group=Gh,
                               head_dim=head_dim, compute_dtype=compute_dtype)

    results = pl.pallas_call(
        kernel,
        out_shape=tuple(out_shape),
        grid_spec=pltpu.PrefetchScalarGridSpec(
            num_scalar_prefetch=0,
            grid=(B // block_b, n_groups),   # reduction (out accum) axis last
            in_specs=[
                x_spec, x_spec, x_spec,      # q, k, v activations
                wcol_spec, bcol_spec,        # wq (scaled, pre-transposed), bq
                wcol_spec, bcol_spec,        # wk, bk
                wcol_spec, bcol_spec,        # wv, bv
                wo_spec, bo_spec,            # wo, bo
            ],
            out_specs=out_specs,
            scratch_shapes=[
                pltpu.VMEM((block_b * S, Gd), jnp.float32),  # per-group context
                pltpu.VMEM((block_b * S, E), jnp.float32),   # out-proj accumulator
            ],
        ),
        compiler_params=pltpu.CompilerParams(
            dimension_semantics=("parallel", "arbitrary"),
            vmem_limit_bytes=vmem_limit,
        ),
    )(query, key, value, wq_t, bq_s, wk_t, bk, wv_t, bv, wo_t, bo)

    if return_attn_weights:
        out, attn = results
        return out, attn
    (out,) = results
    return out


def _reference(query, key, value, params, *, num_heads):
    """Pure-JAX reference mirroring the PyTorch forward."""
    B, S, E = query.shape
    Dh = E // num_heads

    def lin(x, w, b):
        return x @ w.T + b

    Q = lin(query, params["wq"], params["bq"]).reshape(B, S, num_heads, Dh).transpose(0, 2, 1, 3)
    K = lin(key,   params["wk"], params["bk"]).reshape(B, S, num_heads, Dh).transpose(0, 2, 1, 3)
    V = lin(value, params["wv"], params["bv"]).reshape(B, S, num_heads, Dh).transpose(0, 2, 1, 3)
    scores = jnp.einsum("bhqd,bhkd->bhqk", Q, K) / jnp.sqrt(jnp.float32(Dh))
    attn = jax.nn.softmax(scores, axis=-1)
    ctx = jnp.einsum("bhqk,bhkd->bhqd", attn, V)
    ctx = ctx.transpose(0, 2, 1, 3).reshape(B, S, E)
    out = lin(ctx, params["wo"], params["bo"])
    return out, attn


if __name__ == "__main__":
    B, S, E, H = 2, 8, 32, 4   # batch, seq, embed_dim, num_heads (head_dim = 8)

    key = jax.random.PRNGKey(0)
    ks = jax.random.split(key, 11)
    init = 1.0 / math.sqrt(E)
    params = {
        "wq": jax.random.uniform(ks[0], (E, E), jnp.float32, -init, init),
        "bq": jax.random.uniform(ks[1], (E,),   jnp.float32, -init, init),
        "wk": jax.random.uniform(ks[2], (E, E), jnp.float32, -init, init),
        "bk": jax.random.uniform(ks[3], (E,),   jnp.float32, -init, init),
        "wv": jax.random.uniform(ks[4], (E, E), jnp.float32, -init, init),
        "bv": jax.random.uniform(ks[5], (E,),   jnp.float32, -init, init),
        "wo": jax.random.uniform(ks[6], (E, E), jnp.float32, -init, init),
        "bo": jax.random.uniform(ks[7], (E,),   jnp.float32, -init, init),
    }
    q = jax.random.normal(ks[8], (B, S, E), jnp.float32)
    k = jax.random.normal(ks[9], (B, S, E), jnp.float32)
    v = jax.random.normal(ks[10], (B, S, E), jnp.float32)

    # Full module semantics: (out, attn_weights).
    out, attn = multi_head_attention(q, k, v, params, num_heads=H)
    out, attn = jax.block_until_ready((out, attn))

    # Output-only fast path (drops the (B,H,S,S) writeback).
    out_only = multi_head_attention(q, k, v, params, num_heads=H,
                                    return_attn_weights=False)
    out_only = jax.block_until_ready(out_only)

    ref_out, ref_attn = _reference(q, k, v, params, num_heads=H)
    assert out.shape == (B, S, E) and attn.shape == (B, H, S, S)
    assert out_only.shape == (B, S, E)
    assert jnp.allclose(out, ref_out, atol=2e-3, rtol=2e-3)
    assert jnp.allclose(attn, ref_attn, atol=2e-3, rtol=2e-3)
    assert jnp.allclose(out_only, ref_out, atol=2e-3, rtol=2e-3)

    print("KERNEL_OK")
</pallas_src>

<mosaic_0001>
module attributes {stable_mosaic.version = 11 : i64} {
  func.func @_mha_kernel(%arg0: i32, %arg1: i32, %arg2: memref<1x8x32xf32, #tpu.memory_space<vmem>>, %arg3: memref<1x8x32xf32, #tpu.memory_space<vmem>>, %arg4: memref<1x8x32xf32, #tpu.memory_space<vmem>>, %arg5: memref<32x32xf32, #tpu.memory_space<vmem>>, %arg6: memref<1x32xf32, #tpu.memory_space<vmem>>, %arg7: memref<32x32xf32, #tpu.memory_space<vmem>>, %arg8: memref<1x32xf32, #tpu.memory_space<vmem>>, %arg9: memref<32x32xf32, #tpu.memory_space<vmem>>, %arg10: memref<1x32xf32, #tpu.memory_space<vmem>>, %arg11: memref<32x32xf32, #tpu.memory_space<vmem>>, %arg12: memref<1x32xf32, #tpu.memory_space<vmem>>, %arg13: memref<1x8x32xf32, #tpu.memory_space<vmem>>, %arg14: memref<1x4x8x8xf32, #tpu.memory_space<vmem>>, %arg15: memref<8x32xf32, #tpu.memory_space<vmem>>, %arg16: memref<8x32xf32, #tpu.memory_space<vmem>>) attributes {dimension_semantics = [#tpu.dimension_semantics<parallel>, #tpu.dimension_semantics<arbitrary>], iteration_bounds = array<i64: 2, 1>, scalar_prefetch = 0 : i64, scratch_operands = 2 : i64, tpu.core_type = #tpu.core_type<tc>, window_params = [{transform_indices = @transform_0, window_bounds = array<i64: 1, 8, 32>}, {transform_indices = @transform_1, window_bounds = array<i64: 1, 8, 32>}, {transform_indices = @transform_2, window_bounds = array<i64: 1, 8, 32>}, {transform_indices = @transform_3, window_bounds = array<i64: 32, 32>}, {transform_indices = @transform_4, window_bounds = array<i64: 1, 32>}, {transform_indices = @transform_5, window_bounds = array<i64: 32, 32>}, {transform_indices = @transform_6, window_bounds = array<i64: 1, 32>}, {transform_indices = @transform_7, window_bounds = array<i64: 32, 32>}, {transform_indices = @transform_8, window_bounds = array<i64: 1, 32>}, {transform_indices = @transform_9, window_bounds = array<i64: 32, 32>}, {pipeline_mode = #tpu.pipeline_mode<synchronous>, transform_indices = @transform_10, window_bounds = array<i64: 1, 32>}, {transform_indices = @transform_11, window_bounds = array<i64: 1, 8, 32>}, {transform_indices = @transform_12, window_bounds = array<i64: 1, 4, 8, 8>}]} {
    %c0_i32 = arith.constant 0 : i32
    %0 = arith.cmpi eq, %arg1, %c0_i32 : i32
    %1 = arith.extui %0 : i1 to i32
    %c0_i32_0 = arith.constant 0 : i32
    %2 = arith.cmpi ne, %1, %c0_i32_0 : i32
    scf.if %2 {
      %cst_72 = arith.constant 0.000000e+00 : f32
      %129 = vector.broadcast %cst_72 : f32 to vector<8x32xf32>
      %c0_73 = arith.constant 0 : index
      %c0_74 = arith.constant 0 : index
      %130 = vector.load %arg16[%c0_73, %c0_74] : memref<8x32xf32, #tpu.memory_space<vmem>>, vector<8x32xf32>
      tpu.vector_store %arg16[%c0_73, %c0_74], %129 {strides = array<i32>} : memref<8x32xf32, #tpu.memory_space<vmem>>, vector<8x32xf32>,
    } else {
    }
    %c0 = arith.constant 0 : index
    %c0_1 = arith.constant 0 : index
    %c0_2 = arith.constant 0 : index
    %3 = vector.load %arg2[%c0, %c0_1, %c0_2] : memref<1x8x32xf32, #tpu.memory_space<vmem>>, vector<1x8x32xf32>
    %4 = vector.shape_cast %3 : vector<1x8x32xf32> to vector<8x32xf32>
    %c0_3 = arith.constant 0 : index
    %c0_4 = arith.constant 0 : index
    %c0_5 = arith.constant 0 : index
    %5 = vector.load %arg3[%c0_3, %c0_4, %c0_5] : memref<1x8x32xf32, #tpu.memory_space<vmem>>, vector<1x8x32xf32>
    %6 = vector.shape_cast %5 : vector<1x8x32xf32> to vector<8x32xf32>
    %c0_6 = arith.constant 0 : index
    %c0_7 = arith.constant 0 : index
    %c0_8 = arith.constant 0 : index
    %7 = vector.load %arg4[%c0_6, %c0_7, %c0_8] : memref<1x8x32xf32, #tpu.memory_space<vmem>>, vector<1x8x32xf32>
    %8 = vector.shape_cast %7 : vector<1x8x32xf32> to vector<8x32xf32>
    %c0_9 = arith.constant 0 : index
    %c0_10 = arith.constant 0 : index
    %9 = vector.load %arg5[%c0_9, %c0_10] : memref<32x32xf32, #tpu.memory_space<vmem>>, vector<32x32xf32>
    %cst = arith.constant dense<0.000000e+00> : vector<8x32xf32>
    %10 = tpu.matmul %4, %9, %cst {dimension_numbers = #tpu.dot_dimension_numbers<[1], [0], [0], [1], [0, 0, 1, 1], [], []>} : vector<8x32xf32>, vector<32x32xf32>, vector<8x32xf32> -> vector<8x32xf32>
    %c0_11 = arith.constant 0 : index
    %c0_12 = arith.constant 0 : index
    %11 = vector.load %arg6[%c0_11, %c0_12] : memref<1x32xf32, #tpu.memory_space<vmem>>, vector<1x32xf32>
    %12 = vector.broadcast %11 : vector<1x32xf32> to vector<8x32xf32>
    %13 = arith.addf %10, %12 : vector<8x32xf32>
    %c0_13 = arith.constant 0 : index
    %c0_14 = arith.constant 0 : index
    %14 = vector.load %arg7[%c0_13, %c0_14] : memref<32x32xf32, #tpu.memory_space<vmem>>, vector<32x32xf32>
    %cst_15 = arith.constant dense<0.000000e+00> : vector<8x32xf32>
    %15 = tpu.matmul %6, %14, %cst_15 {dimension_numbers = #tpu.dot_dimension_numbers<[1], [0], [0], [1], [0, 0, 1, 1], [], []>} : vector<8x32xf32>, vector<32x32xf32>, vector<8x32xf32> -> vector<8x32xf32>
    %c0_16 = arith.constant 0 : index
    %c0_17 = arith.constant 0 : index
    %16 = vector.load %arg8[%c0_16, %c0_17] : memref<1x32xf32, #tpu.memory_space<vmem>>, vector<1x32xf32>
    %17 = vector.broadcast %16 : vector<1x32xf32> to vector<8x32xf32>
    %18 = arith.addf %15, %17 : vector<8x32xf32>
    %c0_18 = arith.constant 0 : index
    %c0_19 = arith.constant 0 : index
    %19 = vector.load %arg9[%c0_18, %c0_19] : memref<32x32xf32, #tpu.memory_space<vmem>>, vector<32x32xf32>
    %cst_20 = arith.constant dense<0.000000e+00> : vector<8x32xf32>
    %20 = tpu.matmul %8, %19, %cst_20 {dimension_numbers = #tpu.dot_dimension_numbers<[1], [0], [0], [1], [0, 0, 1, 1], [], []>} : vector<8x32xf32>, vector<32x32xf32>, vector<8x32xf32> -> vector<8x32xf32>
    %c0_21 = arith.constant 0 : index
    %c0_22 = arith.constant 0 : index
    %21 = vector.load %arg10[%c0_21, %c0_22] : memref<1x32xf32, #tpu.memory_space<vmem>>, vector<1x32xf32>
    %22 = vector.broadcast %21 : vector<1x32xf32> to vector<8x32xf32>
    %23 = arith.addf %20, %22 : vector<8x32xf32>
    %24 = vector.extract_strided_slice %13 {offsets = [0, 0], sizes = [8, 8], strides = [1, 1]} : vector<8x32xf32> to vector<8x8xf32>
    %25 = vector.shape_cast %24 : vector<8x8xf32> to vector<1x8x8xf32>
    %26 = vector.extract_strided_slice %18 {offsets = [0, 0], sizes = [8, 8], strides = [1, 1]} : vector<8x32xf32> to vector<8x8xf32>
    %27 = vector.shape_cast %26 : vector<8x8xf32> to vector<1x8x8xf32>
    %28 = vector.extract_strided_slice %23 {offsets = [0, 0], sizes = [8, 8], strides = [1, 1]} : vector<8x32xf32> to vector<8x8xf32>
    %29 = vector.shape_cast %28 : vector<8x8xf32> to vector<1x8x8xf32>
    "tpu.trace_start"() <{level = 10 : i32, message = "bqd,bkd->bqk"}> : () -> ()
    %cst_23 = arith.constant dense<0.000000e+00> : vector<1x8x8xf32>
    %30 = tpu.matmul %25, %27, %cst_23 {dimension_numbers = #tpu.dot_dimension_numbers<[2], [2], [1], [1], [0, 0, 0, 1, 1, 1], [0], [0]>} : vector<1x8x8xf32>, vector<1x8x8xf32>, vector<1x8x8xf32> -> vector<1x8x8xf32>
    "tpu.trace_stop"() : () -> ()
    %cst_24 = arith.constant dense<0xFF800000> : vector<1x8xf32>
    %31 = vector.multi_reduction <maximumf>, %30, %cst_24 [2] : vector<1x8x8xf32> to vector<1x8xf32>
    %32 = vector.shape_cast %31 : vector<1x8xf32> to vector<1x8x1xf32>
    %33 = vector.broadcast %32 : vector<1x8x1xf32> to vector<1x8x8xf32>
    %34 = arith.subf %30, %33 : vector<1x8x8xf32>
    %35 = math.exp %34 : vector<1x8x8xf32>
    %cst_25 = arith.constant dense<0.000000e+00> : vector<1x8xf32>
    %36 = vector.multi_reduction <add>, %35, %cst_25 [2] : vector<1x8x8xf32> to vector<1x8xf32>
    %37 = vector.shape_cast %36 : vector<1x8xf32> to vector<1x8x1xf32>
    %cst_26 = arith.constant 1.000000e+00 : f32
    %38 = vector.broadcast %cst_26 : f32 to vector<1x8x1xf32>
    %39 = arith.divf %38, %37 : vector<1x8x1xf32>
    %40 = vector.broadcast %39 : vector<1x8x1xf32> to vector<1x8x8xf32>
    %41 = arith.mulf %35, %40 : vector<1x8x8xf32>
    %c0_27 = arith.constant 0 : index
    %c0_28 = arith.constant 0 : index
    %c0_29 = arith.constant 0 : index
    %c0_30 = arith.constant 0 : index
    %42 = vector.load %arg14[%c0_27, %c0_28, %c0_29, %c0_30] : memref<1x4x8x8xf32, #tpu.memory_space<vmem>>, vector<1x1x8x8xf32>
    %43 = vector.shape_cast %42 : vector<1x1x8x8xf32> to vector<1x8x8xf32>
    %44 = vector.shape_cast %41 : vector<1x8x8xf32> to vector<1x1x8x8xf32>
    tpu.vector_store %arg14[%c0_27, %c0_28, %c0_29, %c0_30], %44 {strides = array<i32>} : memref<1x4x8x8xf32, #tpu.memory_space<vmem>>, vector<1x1x8x8xf32>,
    "tpu.trace_start"() <{level = 10 : i32, message = "bqk,bkd->bqd"}> : () -> ()
    %cst_31 = arith.constant dense<0.000000e+00> : vector<1x8x8xf32>
    %45 = tpu.matmul %41, %29, %cst_31 {dimension_numbers = #tpu.dot_dimension_numbers<[2], [1], [1], [2], [0, 0, 0, 1, 1, 2], [0], [0]>} : vector<1x8x8xf32>, vector<1x8x8xf32>, vector<1x8x8xf32> -> vector<1x8x8xf32>
    "tpu.trace_stop"() : () -> ()
    %46 = vector.shape_cast %45 : vector<1x8x8xf32> to vector<8x8xf32>
    %c0_32 = arith.constant 0 : index
    %c0_33 = arith.constant 0 : index
    %47 = vector.load %arg15[%c0_32, %c0_33] : memref<8x32xf32, #tpu.memory_space<vmem>>, vector<8x8xf32>
    tpu.vector_store %arg15[%c0_32, %c0_33], %46 {strides = array<i32>} : memref<8x32xf32, #tpu.memory_space<vmem>>, vector<8x8xf32>,
    %48 = vector.extract_strided_slice %13 {offsets = [0, 8], sizes = [8, 8], strides = [1, 1]} : vector<8x32xf32> to vector<8x8xf32>
    %49 = vector.shape_cast %48 : vector<8x8xf32> to vector<1x8x8xf32>
    %50 = vector.extract_strided_slice %18 {offsets = [0, 8], sizes = [8, 8], strides = [1, 1]} : vector<8x32xf32> to vector<8x8xf32>
    %51 = vector.shape_cast %50 : vector<8x8xf32> to vector<1x8x8xf32>
    %52 = vector.extract_strided_slice %23 {offsets = [0, 8], sizes = [8, 8], strides = [1, 1]} : vector<8x32xf32> to vector<8x8xf32>
    %53 = vector.shape_cast %52 : vector<8x8xf32> to vector<1x8x8xf32>
    "tpu.trace_start"() <{level = 10 : i32, message = "bqd,bkd->bqk"}> : () -> ()
    %cst_34 = arith.constant dense<0.000000e+00> : vector<1x8x8xf32>
    %54 = tpu.matmul %49, %51, %cst_34 {dimension_numbers = #tpu.dot_dimension_numbers<[2], [2], [1], [1], [0, 0, 0, 1, 1, 1], [0], [0]>} : vector<1x8x8xf32>, vector<1x8x8xf32>, vector<1x8x8xf32> -> vector<1x8x8xf32>
    "tpu.trace_stop"() : () -> ()
    %cst_35 = arith.constant dense<0xFF800000> : vector<1x8xf32>
    %55 = vector.multi_reduction <maximumf>, %54, %cst_35 [2] : vector<1x8x8xf32> to vector<1x8xf32>
    %56 = vector.shape_cast %55 : vector<1x8xf32> to vector<1x8x1xf32>
    %57 = vector.broadcast %56 : vector<1x8x1xf32> to vector<1x8x8xf32>
    %58 = arith.subf %54, %57 : vector<1x8x8xf32>
    %59 = math.exp %58 : vector<1x8x8xf32>
    %cst_36 = arith.constant dense<0.000000e+00> : vector<1x8xf32>
    %60 = vector.multi_reduction <add>, %59, %cst_36 [2] : vector<1x8x8xf32> to vector<1x8xf32>
    %61 = vector.shape_cast %60 : vector<1x8xf32> to vector<1x8x1xf32>
    %cst_37 = arith.constant 1.000000e+00 : f32
    %62 = vector.broadcast %cst_37 : f32 to vector<1x8x1xf32>
    %63 = arith.divf %62, %61 : vector<1x8x1xf32>
    %64 = vector.broadcast %63 : vector<1x8x1xf32> to vector<1x8x8xf32>
    %65 = arith.mulf %59, %64 : vector<1x8x8xf32>
    %c0_38 = arith.constant 0 : index
    %c1 = arith.constant 1 : index
    %c0_39 = arith.constant 0 : index
    %c0_40 = arith.constant 0 : index
    %66 = vector.load %arg14[%c0_38, %c1, %c0_39, %c0_40] : memref<1x4x8x8xf32, #tpu.memory_space<vmem>>, vector<1x1x8x8xf32>
    %67 = vector.shape_cast %66 : vector<1x1x8x8xf32> to vector<1x8x8xf32>
    %68 = vector.shape_cast %65 : vector<1x8x8xf32> to vector<1x1x8x8xf32>
    tpu.vector_store %arg14[%c0_38, %c1, %c0_39, %c0_40], %68 {strides = array<i32>} : memref<1x4x8x8xf32, #tpu.memory_space<vmem>>, vector<1x1x8x8xf32>,
    "tpu.trace_start"() <{level = 10 : i32, message = "bqk,bkd->bqd"}> : () -> ()
    %cst_41 = arith.constant dense<0.000000e+00> : vector<1x8x8xf32>
    %69 = tpu.matmul %65, %53, %cst_41 {dimension_numbers = #tpu.dot_dimension_numbers<[2], [1], [1], [2], [0, 0, 0, 1, 1, 2], [0], [0]>} : vector<1x8x8xf32>, vector<1x8x8xf32>, vector<1x8x8xf32> -> vector<1x8x8xf32>
    "tpu.trace_stop"() : () -> ()
    %70 = vector.shape_cast %69 : vector<1x8x8xf32> to vector<8x8xf32>
    %c0_42 = arith.constant 0 : index
    %c8 = arith.constant 8 : index
    %71 = vector.load %arg15[%c0_42, %c8] : memref<8x32xf32, #tpu.memory_space<vmem>>, vector<8x8xf32>
    tpu.vector_store %arg15[%c0_42, %c8], %70 {strides = array<i32>} : memref<8x32xf32, #tpu.memory_space<vmem>>, vector<8x8xf32>,
    %72 = vector.extract_strided_slice %13 {offsets = [0, 16], sizes = [8, 8], strides = [1, 1]} : vector<8x32xf32> to vector<8x8xf32>
    %73 = vector.shape_cast %72 : vector<8x8xf32> to vector<1x8x8xf32>
    %74 = vector.extract_strided_slice %18 {offsets = [0, 16], sizes = [8, 8], strides = [1, 1]} : vector<8x32xf32> to vector<8x8xf32>
    %75 = vector.shape_cast %74 : vector<8x8xf32> to vector<1x8x8xf32>
    %76 = vector.extract_strided_slice %23 {offsets = [0, 16], sizes = [8, 8], strides = [1, 1]} : vector<8x32xf32> to vector<8x8xf32>
    %77 = vector.shape_cast %76 : vector<8x8xf32> to vector<1x8x8xf32>
    "tpu.trace_start"() <{level = 10 : i32, message = "bqd,bkd->bqk"}> : () -> ()
    %cst_43 = arith.constant dense<0.000000e+00> : vector<1x8x8xf32>
    %78 = tpu.matmul %73, %75, %cst_43 {dimension_numbers = #tpu.dot_dimension_numbers<[2], [2], [1], [1], [0, 0, 0, 1, 1, 1], [0], [0]>} : vector<1x8x8xf32>, vector<1x8x8xf32>, vector<1x8x8xf32> -> vector<1x8x8xf32>
    "tpu.trace_stop"() : () -> ()
    %cst_44 = arith.constant dense<0xFF800000> : vector<1x8xf32>
    %79 = vector.multi_reduction <maximumf>, %78, %cst_44 [2] : vector<1x8x8xf32> to vector<1x8xf32>
    %80 = vector.shape_cast %79 : vector<1x8xf32> to vector<1x8x1xf32>
    %81 = vector.broadcast %80 : vector<1x8x1xf32> to vector<1x8x8xf32>
    %82 = arith.subf %78, %81 : vector<1x8x8xf32>
    %83 = math.exp %82 : vector<1x8x8xf32>
    %cst_45 = arith.constant dense<0.000000e+00> : vector<1x8xf32>
    %84 = vector.multi_reduction <add>, %83, %cst_45 [2] : vector<1x8x8xf32> to vector<1x8xf32>
    %85 = vector.shape_cast %84 : vector<1x8xf32> to vector<1x8x1xf32>
    %cst_46 = arith.constant 1.000000e+00 : f32
    %86 = vector.broadcast %cst_46 : f32 to vector<1x8x1xf32>
    %87 = arith.divf %86, %85 : vector<1x8x1xf32>
    %88 = vector.broadcast %87 : vector<1x8x1xf32> to vector<1x8x8xf32>
    %89 = arith.mulf %83, %88 : vector<1x8x8xf32>
    %c0_47 = arith.constant 0 : index
    %c2 = arith.constant 2 : index
    %c0_48 = arith.constant 0 : index
    %c0_49 = arith.constant 0 : index
    %90 = vector.load %arg14[%c0_47, %c2, %c0_48, %c0_49] : memref<1x4x8x8xf32, #tpu.memory_space<vmem>>, vector<1x1x8x8xf32>
    %91 = vector.shape_cast %90 : vector<1x1x8x8xf32> to vector<1x8x8xf32>
    %92 = vector.shape_cast %89 : vector<1x8x8xf32> to vector<1x1x8x8xf32>
    tpu.vector_store %arg14[%c0_47, %c2, %c0_48, %c0_49], %92 {strides = array<i32>} : memref<1x4x8x8xf32, #tpu.memory_space<vmem>>, vector<1x1x8x8xf32>,
    "tpu.trace_start"() <{level = 10 : i32, message = "bqk,bkd->bqd"}> : () -> ()
    %cst_50 = arith.constant dense<0.000000e+00> : vector<1x8x8xf32>
    %93 = tpu.matmul %89, %77, %cst_50 {dimension_numbers = #tpu.dot_dimension_numbers<[2], [1], [1], [2], [0, 0, 0, 1, 1, 2], [0], [0]>} : vector<1x8x8xf32>, vector<1x8x8xf32>, vector<1x8x8xf32> -> vector<1x8x8xf32>
    "tpu.trace_stop"() : () -> ()
    %94 = vector.shape_cast %93 : vector<1x8x8xf32> to vector<8x8xf32>
    %c0_51 = arith.constant 0 : index
    %c16 = arith.constant 16 : index
    %95 = vector.load %arg15[%c0_51, %c16] : memref<8x32xf32, #tpu.memory_space<vmem>>, vector<8x8xf32>
    tpu.vector_store %arg15[%c0_51, %c16], %94 {strides = array<i32>} : memref<8x32xf32, #tpu.memory_space<vmem>>, vector<8x8xf32>,
    %96 = vector.extract_strided_slice %13 {offsets = [0, 24], sizes = [8, 8], strides = [1, 1]} : vector<8x32xf32> to vector<8x8xf32>
    %97 = vector.shape_cast %96 : vector<8x8xf32> to vector<1x8x8xf32>
    %98 = vector.extract_strided_slice %18 {offsets = [0, 24], sizes = [8, 8], strides = [1, 1]} : vector<8x32xf32> to vector<8x8xf32>
    %99 = vector.shape_cast %98 : vector<8x8xf32> to vector<1x8x8xf32>
    %100 = vector.extract_strided_slice %23 {offsets = [0, 24], sizes = [8, 8], strides = [1, 1]} : vector<8x32xf32> to vector<8x8xf32>
    %101 = vector.shape_cast %100 : vector<8x8xf32> to vector<1x8x8xf32>
    "tpu.trace_start"() <{level = 10 : i32, message = "bqd,bkd->bqk"}> : () -> ()
    %cst_52 = arith.constant dense<0.000000e+00> : vector<1x8x8xf32>
    %102 = tpu.matmul %97, %99, %cst_52 {dimension_numbers = #tpu.dot_dimension_numbers<[2], [2], [1], [1], [0, 0, 0, 1, 1, 1], [0], [0]>} : vector<1x8x8xf32>, vector<1x8x8xf32>, vector<1x8x8xf32> -> vector<1x8x8xf32>
    "tpu.trace_stop"() : () -> ()
    %cst_53 = arith.constant dense<0xFF800000> : vector<1x8xf32>
    %103 = vector.multi_reduction <maximumf>, %102, %cst_53 [2] : vector<1x8x8xf32> to vector<1x8xf32>
    %104 = vector.shape_cast %103 : vector<1x8xf32> to vector<1x8x1xf32>
    %105 = vector.broadcast %104 : vector<1x8x1xf32> to vector<1x8x8xf32>
    %106 = arith.subf %102, %105 : vector<1x8x8xf32>
    %107 = math.exp %106 : vector<1x8x8xf32>
    %cst_54 = arith.constant dense<0.000000e+00> : vector<1x8xf32>
    %108 = vector.multi_reduction <add>, %107, %cst_54 [2] : vector<1x8x8xf32> to vector<1x8xf32>
    %109 = vector.shape_cast %108 : vector<1x8xf32> to vector<1x8x1xf32>
    %cst_55 = arith.constant 1.000000e+00 : f32
    %110 = vector.broadcast %cst_55 : f32 to vector<1x8x1xf32>
    %111 = arith.divf %110, %109 : vector<1x8x1xf32>
    %112 = vector.broadcast %111 : vector<1x8x1xf32> to vector<1x8x8xf32>
    %113 = arith.mulf %107, %112 : vector<1x8x8xf32>
    %c0_56 = arith.constant 0 : index
    %c3 = arith.constant 3 : index
    %c0_57 = arith.constant 0 : index
    %c0_58 = arith.constant 0 : index
    %114 = vector.load %arg14[%c0_56, %c3, %c0_57, %c0_58] : memref<1x4x8x8xf32, #tpu.memory_space<vmem>>, vector<1x1x8x8xf32>
    %115 = vector.shape_cast %114 : vector<1x1x8x8xf32> to vector<1x8x8xf32>
    %116 = vector.shape_cast %113 : vector<1x8x8xf32> to vector<1x1x8x8xf32>
    tpu.vector_store %arg14[%c0_56, %c3, %c0_57, %c0_58], %116 {strides = array<i32>} : memref<1x4x8x8xf32, #tpu.memory_space<vmem>>, vector<1x1x8x8xf32>,
    "tpu.trace_start"() <{level = 10 : i32, message = "bqk,bkd->bqd"}> : () -> ()
    %cst_59 = arith.constant dense<0.000000e+00> : vector<1x8x8xf32>
    %117 = tpu.matmul %113, %101, %cst_59 {dimension_numbers = #tpu.dot_dimension_numbers<[2], [1], [1], [2], [0, 0, 0, 1, 1, 2], [0], [0]>} : vector<1x8x8xf32>, vector<1x8x8xf32>, vector<1x8x8xf32> -> vector<1x8x8xf32>
    "tpu.trace_stop"() : () -> ()
    %118 = vector.shape_cast %117 : vector<1x8x8xf32> to vector<8x8xf32>
    %c0_60 = arith.constant 0 : index
    %c24 = arith.constant 24 : index
    %119 = vector.load %arg15[%c0_60, %c24] : memref<8x32xf32, #tpu.memory_space<vmem>>, vector<8x8xf32>
    tpu.vector_store %arg15[%c0_60, %c24], %118 {strides = array<i32>} : memref<8x32xf32, #tpu.memory_space<vmem>>, vector<8x8xf32>,
    %c0_61 = arith.constant 0 : index
    %c0_62 = arith.constant 0 : index
    %120 = vector.load %arg16[%c0_61, %c0_62] : memref<8x32xf32, #tpu.memory_space<vmem>>, vector<8x32xf32>
    %c0_63 = arith.constant 0 : index
    %c0_64 = arith.constant 0 : index
    %121 = vector.load %arg15[%c0_63, %c0_64] : memref<8x32xf32, #tpu.memory_space<vmem>>, vector<8x32xf32>
    %c0_65 = arith.constant 0 : index
    %c0_66 = arith.constant 0 : index
    %122 = vector.load %arg11[%c0_65, %c0_66] : memref<32x32xf32, #tpu.memory_space<vmem>>, vector<32x32xf32>
    %cst_67 = arith.constant dense<0.000000e+00> : vector<8x32xf32>
    %123 = tpu.matmul %121, %122, %cst_67 {dimension_numbers = #tpu.dot_dimension_numbers<[1], [0], [0], [1], [0, 0, 1, 1], [], []>} : vector<8x32xf32>, vector<32x32xf32>, vector<8x32xf32> -> vector<8x32xf32>
    %124 = arith.addf %120, %123 : vector<8x32xf32>
    %c0_68 = arith.constant 0 : index
    %c0_69 = arith.constant 0 : index
    %125 = vector.load %arg16[%c0_68, %c0_69] : memref<8x32xf32, #tpu.memory_space<vmem>>, vector<8x32xf32>
    tpu.vector_store %arg16[%c0_68, %c0_69], %124 {strides = array<i32>} : memref<8x32xf32, #tpu.memory_space<vmem>>, vector<8x32xf32>,
    %c0_i32_70 = arith.constant 0 : i32
    %126 = arith.cmpi eq, %arg1, %c0_i32_70 : i32
    %127 = arith.extui %126 : i1 to i32
    %c0_i32_71 = arith.constant 0 : i32
    %128 = arith.cmpi ne, %127, %c0_i32_71 : i32
    scf.if %128 {
      %c0_72 = arith.constant 0 : index
      %c0_73 = arith.constant 0 : index
      %129 = vector.load %arg16[%c0_72, %c0_73] : memref<8x32xf32, #tpu.memory_space<vmem>>, vector<8x32xf32>
      %c0_74 = arith.constant 0 : index
      %c0_75 = arith.constant 0 : index
      %130 = vector.load %arg12[%c0_74, %c0_75] : memref<1x32xf32, #tpu.memory_space<vmem>>, vector<1x32xf32>
      %131 = vector.broadcast %130 : vector<1x32xf32> to vector<8x32xf32>
      %132 = arith.addf %129, %131 : vector<8x32xf32>
      %133 = vector.shape_cast %132 : vector<8x32xf32> to vector<1x8x32xf32>
      %c0_76 = arith.constant 0 : index
      %c0_77 = arith.constant 0 : index
      %c0_78 = arith.constant 0 : index
      %134 = vector.load %arg13[%c0_76, %c0_77, %c0_78] : memref<1x8x32xf32, #tpu.memory_space<vmem>>, vector<1x8x32xf32>
      tpu.vector_store %arg13[%c0_76, %c0_77, %c0_78], %133 {strides = array<i32>} : memref<1x8x32xf32, #tpu.memory_space<vmem>>, vector<1x8x32xf32>,
    } else {
    }
    return
  }
  func.func @transform_0(%arg0: i32, %arg1: i32) -> (i32, i32, i32) {
    %c0_i32 = arith.constant 0 : i32
    %c0_i32_0 = arith.constant 0 : i32
    %c0_i32_1 = arith.constant 0 : i32
    return %arg0, %c0_i32, %c0_i32_0 : i32, i32, i32
  }
  func.func @transform_1(%arg0: i32, %arg1: i32) -> (i32, i32, i32) {
    %c0_i32 = arith.constant 0 : i32
    %c0_i32_0 = arith.constant 0 : i32
    %c0_i32_1 = arith.constant 0 : i32
    return %arg0, %c0_i32, %c0_i32_0 : i32, i32, i32
  }
  func.func @transform_2(%arg0: i32, %arg1: i32) -> (i32, i32, i32) {
    %c0_i32 = arith.constant 0 : i32
    %c0_i32_0 = arith.constant 0 : i32
    %c0_i32_1 = arith.constant 0 : i32
    return %arg0, %c0_i32, %c0_i32_0 : i32, i32, i32
  }
  func.func @transform_3(%arg0: i32, %arg1: i32) -> (i32, i32) {
    %c0_i32 = arith.constant 0 : i32
    %c0_i32_0 = arith.constant 0 : i32
    return %c0_i32, %arg1 : i32, i32
  }
  func.func @transform_4(%arg0: i32, %arg1: i32) -> (i32, i32) {
    %c0_i32 = arith.constant 0 : i32
    %c0_i32_0 = arith.constant 0 : i32
    return %c0_i32, %arg1 : i32, i32
  }
  func.func @transform_5(%arg0: i32, %arg1: i32) -> (i32, i32) {
    %c0_i32 = arith.constant 0 : i32
    %c0_i32_0 = arith.constant 0 : i32
    return %c0_i32, %arg1 : i32, i32
  }
  func.func @transform_6(%arg0: i32, %arg1: i32) -> (i32, i32) {
    %c0_i32 = arith.constant 0 : i32
    %c0_i32_0 = arith.constant 0 : i32
    return %c0_i32, %arg1 : i32, i32
  }
  func.func @transform_7(%arg0: i32, %arg1: i32) -> (i32, i32) {
    %c0_i32 = arith.constant 0 : i32
    %c0_i32_0 = arith.constant 0 : i32
    return %c0_i32, %arg1 : i32, i32
  }
  func.func @transform_8(%arg0: i32, %arg1: i32) -> (i32, i32) {
    %c0_i32 = arith.constant 0 : i32
    %c0_i32_0 = arith.constant 0 : i32
    return %c0_i32, %arg1 : i32, i32
  }
  func.func @transform_9(%arg0: i32, %arg1: i32) -> (i32, i32) {
    %c0_i32 = arith.constant 0 : i32
    %c0_i32_0 = arith.constant 0 : i32
    return %arg1, %c0_i32 : i32, i32
  }
  func.func @transform_10(%arg0: i32, %arg1: i32) -> (i32, i32) {
    %c0_i32 = arith.constant 0 : i32
    %c0_i32_0 = arith.constant 0 : i32
    %c0_i32_1 = arith.constant 0 : i32
    return %c0_i32, %c0_i32_0 : i32, i32
  }
  func.func @transform_11(%arg0: i32, %arg1: i32) -> (i32, i32, i32) {
    %c0_i32 = arith.constant 0 : i32
    %c0_i32_0 = arith.constant 0 : i32
    %c0_i32_1 = arith.constant 0 : i32
    return %arg0, %c0_i32, %c0_i32_0 : i32, i32, i32
  }
  func.func @transform_12(%arg0: i32, %arg1: i32) -> (i32, i32, i32, i32) {
    %c0_i32 = arith.constant 0 : i32
    %c0_i32_0 = arith.constant 0 : i32
    %c0_i32_1 = arith.constant 0 : i32
    return %arg0, %arg1, %c0_i32, %c0_i32_0 : i32, i32, i32, i32
  }
}

</mosaic_0001>

<bundles_post_ra>
// kernel: tpu_custom_call.1
= control target key start
LH: loop header
LB: loop body
LE: loop exit
PB: predicated region body
PF: predicated region fallthrough
CT: control target
= control target key end

     0   :  { %s3281_s0 = inlined_call_operand.hbm [shape: f32[2,8,32], index: 0, kind: input, shape index: {}]   ;;  %s3282_s1 = inlined_call_operand.hbm [shape: f32[2,8,32], index: 1, kind: input, shape index: {}]   ;;  %s3283_s2 = inlined_call_operand.hbm [shape: f32[2,8,32], index: 2, kind: input, shape index: {}]   ;;  %s3284_s3 = inlined_call_operand.hbm [shape: f32[32,32], index: 3, kind: input, shape index: {}]   ;;  %s3285_s4 = inlined_call_operand.vmem [shape: f32[1,32], index: 4, kind: input, shape index: {}]   ;;  %s3286_s5 = inlined_call_operand.hbm [shape: f32[32,32], index: 5, kind: input, shape index: {}]   ;;  %s3287_s6 = inlined_call_operand.vmem [shape: f32[1,32], index: 6, kind: input, shape index: {}]   ;;  %s3288_s7 = inlined_call_operand.hbm [shape: f32[32,32], index: 7, kind: input, shape index: {}]   ;;  %s3289_s8 = inlined_call_operand.hbm [shape: f32[1,32], index: 8, kind: input, shape index: {}]   ;;  %s3290_s9 = inlined_call_operand.vmem [shape: f32[32,32], index: 9, kind: input, shape index: {}]   ;;  %s3291_s10 = inlined_call_operand.vmem [shape: f32[1,32], index: 10, kind: input, shape index: {}]   ;;  %s3292_s11 = inlined_call_operand.hbm [shape: f32[2,8,32], index: 11, kind: output, shape index: {0}]   ;;  %s3293_s12 = inlined_call_operand.hbm [shape: f32[2,4,8,8], index: 12, kind: output, shape index: {1}]  }
   0x1   :  { %3321 = sst [smem:[#allocation33_spill]] %s3282_s1 }
   0x2   :  { %3322 = sst [smem:[#allocation34_spill]] %s3284_s3 }
   0x3   :  { %3323 = sst [smem:[#allocation35_spill]] %s3288_s7 }
   0x4   :  { %3324 = sst [smem:[#allocation36_spill]] %s3290_s9 }
   0x5   :  { %3325 = sst [smem:[#allocation37_spill]] %s3291_s10 }
   0x6   :  { %3326 = sst [smem:[#allocation38_spill]] %s3292_s11 }
   0x7   :  { %3327 = sst [smem:[#allocation39_spill]] %s3293_s12 }
   0x8   :  { %18 = vsyncpa [#allocation5], 0 }
   0x9   :  { %20 = vsyncpa [#allocation5 + $0x1], 0 }
   0xa   :  { %21 = vsyncpa [#allocation8], 0 }
   0xb   :  { %23 = vsyncpa [#allocation8 + $0x1], 0 }
   0xc   :  { %24 = vsyncpa [#allocation11], 0 }
   0xd   :  { %25 = vsyncpa [#allocation14], 0 }
   0xe   :  { %26 = vsyncpa [#allocation6], 0 }
   0xf   :  { %28 = vsyncpa [#allocation6 + $0x1], 0 }
  0x10   :  { %29 = vsyncpa [#allocation18], 0 }
  0x11   :  { %31 = vsyncpa [#allocation18 + $0x1], 0  ;;  %s2745_s21 = smov 0   ;;  %s2747_s22 = smov 0  }
  0x12   :  { %s2749_s23 = smov 0   ;;  %s2751_s24 = smov 0  }
  0x13   :  { %s2753_s25 = smov 0   ;;  %s2755_s26 = smov 0  }
  0x14 LB: > { %3328 = sst [smem:[#allocation25_spill]] %s2637_s21  ;;  %s2776_s27 = sadd.s32 4294967295, %s2657_s26   ;;  %s2657_s26 = sphi %s2755_s26, %s37_s26   ;;  %s2653_s25 = sphi %s2753_s25, %s3377_s25   ;;  %s2649_s24 = sphi %s2751_s24, %s3376_s24   ;;  %s2645_s23 = sphi %s2749_s23, %s3380_s23   ;;  %s2641_s22 = sphi %s2747_s22, %s3379_s22   ;;  %s2637_s21 = sphi %s2745_s21, %s3378_s21  }
  0x15   : > { %3329 = sst [smem:[#allocation26_spill]] %s2649_s24  ;;  %p1983_p0 = scmp.ge.s32.totalorder %s2657_s26, 1 }
  0x16   : > { %3330 = sst [smem:[#allocation27_spill]] %s2653_s25  ;;  %p3305_p1 = scmp.eq.s32.totalorder %s2776_s27, 0 }
  0x17   : > { %3331 = sst [smem:[#allocation28_spill]] %s2657_s26  ;;  %p389_p2 = scmp.lt.s32.totalorder %s2657_s26, 3 }
  0x18   : > { %s2659_s29 = smov [#allocation10]   ;;  %s2660_s14 = smov [#allocation13]  }
  0x19   : > { %p2781_p3 = pnand %p1983_p0, %p389_p2  ;;  %s403_s30 = sshll.u32 %s2659_s29, 4  ;;  %s2785_s30 = int_to_ptr.vmem [resolvable:$true] %s403_s30 }
  0x1a   : > { %s445_s15 = sshll.u32 %s2660_s14, 4  ;;  %s3334_s3 = sld [smem:[#allocation34_spill]]  ;;  %s2796_s15 = int_to_ptr.vmem [resolvable:$true] %s445_s15 }
  0x1b   : > { %s3332_s28 = scalar_select %p2781_p3, 1, 0 }
  0x1c   : > { %p2209_p4 = pneg %p2781_p3 }
  0x1e   : > { %p2792_p6 = pnand %p2209_p4, %p3305_p1 }
  0x20   : > { %s3333_s13 = scalar_select %p2792_p6, 1, 0 }
  0x21   : > { %s2329_s18 = scalar_lea.hbm %s3334_s3, 512  ;;  %p2806_p8 = pneg %p2792_p6 }
  0x22   : > { %p2330_p7 = scmp.ne.s32.totalorder %s3334_s3, %s2329_s18  ;;  %p2336_p11 = scmp.lt.u32.totalorder %s2329_s18, %s3334_s3 }
  0x23   : > { %s3335_s29 = scalar_select %p2806_p8, 1, 0 }
  0x24   : > { %p2332_p9 = pnand %p2806_p8, %p2330_p7 }
  0x26   : > { %p2333_p10 = pneg %p2332_p9 }
  0x28   : > { %p2338_p12 = pnand %p2336_p11, %p2333_p10 }
  0x2a   : > { %2341 = shalt.err (!%p2338_p12)
}
  0x2b   : > { %s2342_s16 = scalar_lea.vmem %s2785_s30, 512  ;;  %p2350_p4 = scmp.lt.s32.totalorder %s2785_s30, %s2785_s30 }
  0x2c   : > { %p2343_p13 = scmp.ne.s32.totalorder %s2785_s30, %s2342_s16  ;;  %p2351_p5 = scmp.lt.s32.totalorder %s2342_s16, %s2342_s16 }
  0x2e   : > { %p2345_p0 = pnand %p2343_p13, %p2806_p8  ;;  %p2352_p7 = por %p2351_p5, %p2350_p4 }
  0x30   : > { %p2346_p2 = pneg %p2345_p0 }
  0x32   : > { %p2353_p9 = pnand %p2352_p7, %p2346_p2 }
  0x34   : > { %2356 = shalt.err (!%p2353_p9)
}
  0x35   : > { %s3298_s17 = smov 128   ;;  %s3299_s11 = smov 8  }
  0x36   : > { %2212 = dma.hbm_to_vmem [thread:$0]  (!%p2792_p6), %s3334_s3, 512, %s2785_s30, [#allocation11], %s3298_s17, %s3298_s17, %s3299_s11  }
  0x37   : > { %s3336_s7 = sld [smem:[#allocation35_spill]] }
  0x3d   : > { %s2357_s16 = scalar_lea.hbm %s3336_s7, 512 }
  0x3e   : > { %p2358_p5 = scmp.ne.s32.totalorder %s3336_s7, %s2357_s16  ;;  %p2364_p12 = scmp.lt.u32.totalorder %s2357_s16, %s3336_s7 }
  0x40   : > { %p2360_p10 = pnand %p2358_p5, %p2806_p8 }
  0x42   : > { %p2361_p11 = pneg %p2360_p10 }
  0x44   : > { %p2366_p13 = pnand %p2364_p12, %p2361_p11 }
  0x46   : > { %2369 = shalt.err (!%p2366_p13)
}
  0x47   : > { %s2370_s30 = scalar_lea.vmem %s2796_s15, 512  ;;  %p2378_p7 = scmp.lt.s32.totalorder %s2796_s15, %s2796_s15 }
  0x48   : > { %p2371_p0 = scmp.ne.s32.totalorder %s2796_s15, %s2370_s30  ;;  %p2379_p9 = scmp.lt.s32.totalorder %s2370_s30, %s2370_s30 }
  0x4a   : > { %p2373_p2 = pnand %p2371_p0, %p2806_p8  ;;  %p2380_p5 = por %p2379_p9, %p2378_p7 }
  0x4c   : > { %p2374_p4 = pneg %p2373_p2 }
  0x4e   : > { %p2381_p10 = pnand %p2380_p5, %p2374_p4 }
  0x50   : > { %2384 = shalt.err (!%p2381_p10)
}
  0x51   : > { %2218 = dma.hbm_to_vmem [thread:$0]  (!%p2792_p6), %s3336_s7, 512, %s2796_s15, [#allocation14], %s3298_s17, %s3298_s17, %s3299_s11  }
  0x52   : > { %s1982_s12 = sadd.s32 4294967294, %s2657_s26   ;;  %s49_s24 = sadd.s32 1, %s2653_s25 }
  0x53   : > { %p51_p11 = scmp.ge.s32.totalorder %s49_s24, 2  ;;  %s56_s18 = sadd.s32 1, %s2645_s23 }
  0x54   : > { %p63_p12 = scmp.ne.s32.totalorder %s2645_s23, %s2641_s22  ;;  %p64_p13 = scmp.eq.s32.totalorder %s2657_s26, 0 }
  0x55   : > { %s3382_s24 = smov (%p51_p11, %s49_s24), 0  ;;  %p69_p2 = scmp.ne.s32.totalorder %s2641_s22, %s2637_s21 }
  0x56   : > { %3337 = sst [smem:[#allocation29_spill]] %s3382_s24  ;;  %p2864_p0 = por %p64_p13, %p63_p12 }
  0x57   : > { %s53_s15 = ssub.s32 %s2653_s25, %s3382_s24  ;;  %p348_p4 = scmp.eq.s32.totalorder %s2776_s27, 1 }
  0x58   : > { %p54_p7 = scmp.eq.s32.totalorder %s53_s15, 0  ;;  %p2875_p9 = por %p3305_p1, %p69_p2 }
  0x59   : > { %p2879_p5 = por %p348_p4, %p63_p12  ;;  %p354_p10 = scmp.eq.s32.totalorder %s1982_s12, 1 }
  0x5a   : > { %s3339_s20 = scalar_select %p2875_p9, 1, 0 }
  0x5b   : > { %s3340_s14 = scalar_select %p2879_p5, 1, 0 }
  0x5c   : > { %s2884_s16 = scalar_select %p54_p7, %s2645_s23, %s56_s18  }
  0x5d   : > { %3341 = sst [smem:[#allocation30_spill]] %s3340_s14  ;;  %p2886_p11 = por %p354_p10, %p69_p2 }
  0x5e   : > { %3342 = sst [smem:[#allocation31_spill]] %s2884_s16  ;;  %p2243_p13 = scmp.lt.s32.totalorder %s2657_s26, 2 }
  0x5f   : > { %s3343_s30 = scalar_select %p2886_p11, 1, 0 }
  0x60   : > { %s3300_s9 = sand.u32 1, %s2645_s23   ;;  %s2893_s10 = sshll.u32 %s2653_s25, 7 }
  0x61   : > { %3344 = sst [smem:[#allocation32_spill]] %s3343_s30  ;;  %s2897_s15 = sshll.u32 %s3300_s9, 3 }
  0x62   : > { %p2901_p12 = pnand %p2243_p13, %p2864_p0  ;;  %s502_s12 = sand.u32 1, %s2657_s26  }
  0x63   : > { %s3346_s1 = sld [smem:[#allocation33_spill]]  ;;  %s506_s7 = scalar_lea.vmem [#allocation7], %s2897_s15 }
  0x64   : > { %s3345_s17 = scalar_select %p2901_p12, 1, 0 }
  0x65   : > { %s513_s9 = sshll.u32 %s506_s7, 4  ;;  %s2915_s19 = scalar_lea.sflag [#allocation8], %s502_s12  ;;  %s2913_s9 = int_to_ptr.vmem [resolvable:$true] %s513_s9 }
  0x66   : > { %p2921_p2 = pneg %p2901_p12 }
  0x68   : > { %s3347_s25 = scalar_select %p2921_p2, 1, 0 }
  0x69   : > { %s2910_s3 = scalar_lea.hbm %s3346_s1, %s2893_s10  ;;  %s2390_s16 = scalar_lea.hbm %s3346_s1, 256 }
  0x6a   : > { %s2385_s24 = scalar_lea.hbm %s2910_s3, 128  ;;  %p2391_p10 = scmp.lt.u32.totalorder %s2910_s3, %s3346_s1 }
  0x6b   : > { %p2386_p0 = scmp.ne.s32.totalorder %s2910_s3, %s2385_s24  ;;  %p2392_p13 = scmp.lt.u32.totalorder %s2390_s16, %s2385_s24 }
  0x6c   : > { %p2394_p11 = scmp.lt.u32.totalorder %s2385_s24, %s2910_s3 }
  0x6d   : > { %p2388_p4 = pnand %p2921_p2, %p2386_p0  ;;  %p2393_p1 = por %p2392_p13, %p2391_p10 }
  0x6f   : > { %p2389_p7 = pneg %p2388_p4  ;;  %p2395_p5 = por %p2394_p11, %p2393_p1 }
  0x71   : > { %p2396_p9 = pnand %p2395_p5, %p2389_p7 }
  0x73   : > { %2399 = shalt.err (!%p2396_p9)
}
  0x74   : > { %s2400_s12 = scalar_lea.vmem %s2913_s9, 128  ;;  %s2663_s11 = smov [#allocation7]  }
  0x75   : > { %p2401_p0 = scmp.ne.s32.totalorder %s2913_s9, %s2400_s12  ;;  %s2405_s18 = sshll.u32 %s2663_s11, 4  ;;  %s2406_s18 = int_to_ptr.vmem [resolvable:$false] %s2405_s18 }
  0x76   : > { %s2407_s26 = scalar_lea.vmem %s2406_s18, 256  ;;  %p2408_p6 = scmp.lt.s32.totalorder %s2913_s9, %s2406_s18 }
  0x77   : > { %p2403_p4 = pnand %p2401_p0, %p2921_p2  ;;  %p2409_p8 = scmp.lt.s32.totalorder %s2407_s26, %s2400_s12 }
  0x79   : > { %p2404_p3 = pneg %p2403_p4  ;;  %p2410_p10 = por %p2409_p8, %p2408_p6 }
  0x7b   : > { %p2411_p13 = pnand %p2410_p10, %p2404_p3 }
  0x7d   : > { %2414 = shalt.err (!%p2411_p13)
}
  0x7e   : > { %2228 = dma.hbm_to_vmem [thread:$0]  (!%p2901_p12), %s2910_s3, 128, %s2913_s9, %s2915_s19  }
  0x7f   : > { %s2664_s24 = smov [#allocation12]   ;;  %s2665_s7 = smov [#allocation15]  }
  0x80   : > { %s424_s16 = sshll.u32 %s2664_s24, 4  ;;  %s461_s1 = sshll.u32 %s2665_s7, 4  ;;  %s425_s16 = int_to_ptr.vmem [resolvable:$true] %s424_s16  ;;  %s462_s1 = int_to_ptr.vmem [resolvable:$true] %s461_s1 }
  0x81   : > { %s2415_s18 = scalar_lea.hbm %s3286_s5, 512  ;;  %p3348_p3 = scmp.ne.s32.totalorder %s3335_s29, 0 }
  0x82   : > { %p2416_p1 = scmp.ne.s32.totalorder %s3286_s5, %s2415_s18  ;;  %p2422_p9 = scmp.lt.u32.totalorder %s2415_s18, %s3286_s5 }
  0x84   : > { %p2418_p6 = pnand %p2416_p1, %p3348_p3 }
  0x86   : > { %p2419_p8 = pneg %p2418_p6 }
  0x88   : > { %p2424_p5 = pnand %p2422_p9, %p2419_p8 }
  0x8a   : > { %2427 = shalt.err (!%p2424_p5)
}
  0x8b   : > { %s2428_s3 = scalar_lea.vmem %s425_s16, 512  ;;  %p2436_p4 = scmp.lt.s32.totalorder %s425_s16, %s425_s16 }
  0x8c   : > { %p2429_p11 = scmp.ne.s32.totalorder %s425_s16, %s2428_s3  ;;  %p2437_p10 = scmp.lt.s32.totalorder %s2428_s3, %s2428_s3 }
  0x8e   : > { %p2431_p7 = pnand %p2429_p11, %p3348_p3  ;;  %p2438_p13 = por %p2437_p10, %p2436_p4 }
  0x90   : > { %p2432_p0 = pneg %p2431_p7 }
  0x92   : > { %p2439_p12 = pnand %p2438_p13, %p2432_p0 }
  0x94   : > { %2442 = shalt.err (!%p2439_p12)
}
  0x95   : > { %p3349_p1 = scmp.ne.s32.totalorder %s3333_s13, 0  ;;  %s3350_s30 = smov 8  }
  0x96   : > { %s3351_s9 = smov 128   ;;  %s2443_s11 = scalar_lea.hbm %s3289_s8, 16 }
  0x97   : > { %2215 = dma.hbm_to_vmem [thread:$0]  (!%p3349_p1), %s3286_s5, 512, %s425_s16, [#allocation11], %s3351_s9, %s3351_s9, %s3350_s30  }
  0x98   : > { %p2444_p6 = scmp.ne.s32.totalorder %s3289_s8, %s2443_s11  ;;  %p2450_p9 = scmp.lt.u32.totalorder %s2443_s11, %s3289_s8 }
  0x9a   : > { %p2446_p12 = pnand %p2444_p6, %p3348_p3 }
  0x9c   : > { %p2447_p8 = pneg %p2446_p12 }
  0x9e   : > { %p2452_p5 = pnand %p2450_p9, %p2447_p8 }
  0xa0   : > { %2455 = shalt.err (!%p2452_p5)
}
  0xa1   : > { %s2456_s21 = scalar_lea.vmem %s462_s1, 16  ;;  %s2463_s16 = scalar_lea.vmem %s462_s1, 32 }
  0xa2   : > { %p2457_p11 = scmp.ne.s32.totalorder %s462_s1, %s2456_s21  ;;  %p2464_p4 = scmp.lt.s32.totalorder %s462_s1, %s462_s1 }
  0xa3   : > { %p2465_p10 = scmp.lt.s32.totalorder %s2463_s16, %s2456_s21 }
  0xa4   : > { %p2459_p7 = pnand %p2457_p11, %p3348_p3 }
  0xa5   : > { %p2466_p13 = por %p2465_p10, %p2464_p4 }
  0xa6   : > { %p2460_p0 = pneg %p2459_p7 }
  0xa8   : > { %p2467_p2 = pnand %p2466_p13, %p2460_p0 }
  0xaa   : > { %2470 = shalt.err (!%p2467_p2)
}
  0xab   : > { %2221 = dma.hbm_to_vmem [thread:$0]  (!%p3349_p1), %s3289_s8, 16, %s462_s1, [#allocation14]  }
  0xac   : > { %s2988_s24 = scalar_lea.hbm %s3281_s0, %s2893_s10  ;;  %s488_s7 = scalar_lea.vmem [#allocation4], %s2897_s15 }
  0xad   : > { %s495_s13 = sshll.u32 %s488_s7, 4  ;;  %s2997_s12 = scalar_lea.hbm %s3283_s2, %s2893_s10  ;;  %s2991_s13 = int_to_ptr.vmem [resolvable:$true] %s495_s13 }
  0xae   : > { %s3352_s26 = sand.u32 1, %s2645_s23   ;;  %s2471_s3 = scalar_lea.hbm %s2988_s24, 128 }
  0xaf   : > { %s485_s1 = scalar_lea.sflag [#allocation5], %s3352_s26  ;;  %p2472_p2 = scmp.ne.s32.totalorder %s2988_s24, %s2471_s3 }
  0xb0   : > { %p3353_p3 = scmp.ne.s32.totalorder %s3347_s25, 0  ;;  %s2476_s30 = scalar_lea.hbm %s3281_s0, 256 }
  0xb1   : > { %p2477_p12 = scmp.lt.u32.totalorder %s2988_s24, %s3281_s0  ;;  %p2478_p8 = scmp.lt.u32.totalorder %s2476_s30, %s2471_s3 }
  0xb2   : > { %p2474_p1 = pnand %p2472_p2, %p3353_p3  ;;  %p2480_p5 = scmp.lt.u32.totalorder %s2471_s3, %s2988_s24 }
  0xb3   : > { %p2479_p9 = por %p2478_p8, %p2477_p12 }
  0xb4   : > { %p2475_p6 = pneg %p2474_p1 }
  0xb5   : > { %p2481_p11 = por %p2480_p5, %p2479_p9 }
  0xb7   : > { %p2482_p7 = pnand %p2481_p11, %p2475_p6 }
  0xb9   : > { %2485 = shalt.err (!%p2482_p7)
}
  0xba   : > { %s2486_s10 = scalar_lea.vmem %s2991_s13, 128  ;;  %s2666_s14 = smov [#allocation4]  }
  0xbb   : > { %p2487_p0 = scmp.ne.s32.totalorder %s2991_s13, %s2486_s10  ;;  %s2491_s7 = sshll.u32 %s2666_s14, 4  ;;  %s2492_s7 = int_to_ptr.vmem [resolvable:$false] %s2491_s7 }
  0xbc   : > { %s2493_s11 = scalar_lea.vmem %s2492_s7, 256  ;;  %p2494_p13 = scmp.lt.s32.totalorder %s2991_s13, %s2492_s7 }
  0xbd   : > { %p2489_p4 = pnand %p2487_p0, %p3353_p3  ;;  %p2495_p2 = scmp.lt.s32.totalorder %s2493_s11, %s2486_s10 }
  0xbf   : > { %p2490_p10 = pneg %p2489_p4  ;;  %p2496_p1 = por %p2495_p2, %p2494_p13 }
  0xc1   : > { %p2497_p12 = pnand %p2496_p1, %p2490_p10 }
  0xc3   : > { %2500 = shalt.err (!%p2497_p12)
}
  0xc4   : > { %p3354_p6 = scmp.ne.s32.totalorder %s3345_s17, 0  ;;  %s524_s18 = scalar_lea.vmem [#allocation9], %s2897_s15 }
  0xc5   : > { %s531_s26 = sshll.u32 %s524_s18, 4  ;;  %s2501_s3 = scalar_lea.hbm %s2997_s12, 128  ;;  %s532_s26 = int_to_ptr.vmem [resolvable:$true] %s531_s26 }
  0xc6   : > { %2225 = dma.hbm_to_vmem [thread:$0]  (!%p3354_p6), %s2988_s24, 128, %s2991_s13, %s485_s1  }
  0xc7   : > { %p2502_p8 = scmp.ne.s32.totalorder %s2997_s12, %s2501_s3  ;;  %s2506_s30 = scalar_lea.hbm %s3283_s2, 256 }
  0xc8   : > { %p2507_p11 = scmp.lt.u32.totalorder %s2997_s12, %s3283_s2  ;;  %p2508_p7 = scmp.lt.u32.totalorder %s2506_s30, %s2501_s3 }
  0xc9   : > { %p2504_p9 = pnand %p2502_p8, %p3353_p3  ;;  %p2510_p4 = scmp.lt.u32.totalorder %s2501_s3, %s2997_s12 }
  0xca   : > { %p2509_p0 = por %p2508_p7, %p2507_p11 }
  0xcb   : > { %p2505_p5 = pneg %p2504_p9 }
  0xcc   : > { %p2511_p10 = por %p2510_p4, %p2509_p0 }
  0xce   : > { %p2512_p13 = pnand %p2511_p10, %p2505_p5 }
  0xd0   : > { %2515 = shalt.err (!%p2512_p13)
}
  0xd1   : > { %s2516_s15 = scalar_lea.vmem %s532_s26, 128  ;;  %s2667_s24 = smov [#allocation9]  }
  0xd2   : > { %p2517_p2 = scmp.ne.s32.totalorder %s532_s26, %s2516_s15  ;;  %s2521_s13 = sshll.u32 %s2667_s24, 4  ;;  %s2522_s13 = int_to_ptr.vmem [resolvable:$false] %s2521_s13 }
  0xd3   : > { %s2523_s1 = scalar_lea.vmem %s2522_s13, 256  ;;  %p2524_p8 = scmp.lt.s32.totalorder %s532_s26, %s2522_s13 }
  0xd4   : > { %p2519_p1 = pnand %p2517_p2, %p3353_p3  ;;  %p2525_p9 = scmp.lt.s32.totalorder %s2523_s1, %s2516_s15 }
  0xd6   : > { %p2520_p12 = pneg %p2519_p1  ;;  %p2526_p6 = por %p2525_p9, %p2524_p8 }
  0xd8   : > { %p2527_p7 = pnand %p2526_p6, %p2520_p12 }
  0xda   : > { %2530 = shalt.err (!%p2527_p7)
}
  0xdb   : > { %p3355_p11 = scmp.ne.s32.totalorder %s3345_s17, 0  ;;  %p3356_p5 = scmp.ne.s32.totalorder %s3332_s28, 0 }
  0xdc   : > { %s3044_s25 = sand.u32 (!%p3356_p5), 1, %s2641_s22   ;;  %p3357_p3 = scmp.ne.s32.totalorder (!%p3356_p5), %s3339_s20, 0 }
  0xdd   : > { %2231 = dma.hbm_to_vmem [thread:$0]  (!%p3355_p11), %s2997_s12, 128, %s532_s26, %s2915_s19  }
  0xde   : > { %540 = sbr.rel (%p3356_p5) target bundleno = 2162 (0x872), region = 64  ;;  %s3047_s10 = sshll.u32 (!%p3356_p5), %s3044_s25, 3 }
  0xdf   : > { %s543_s14 = scalar_lea.sflag (!%p3356_p5), [#allocation5], %s3044_s25  ;;  %s546_s7 = scalar_lea.vmem (!%p3356_p5), [#allocation4], %s3047_s10 }
  0xe5   : > { %2612 = dma.done.wait (%p3357_p3), %s543_s14, 128  }
  0xe6   : > { %2614 = vsyncadd (%p3357_p3), %s543_s14, 4294967168  ;;  %s551_s28 = sand.u32 1, %s2776_s27   ;;  %s555_s19 = scalar_lea.vmem [#allocation7], %s3047_s10 }
  0xe7   : > { %s552_s17 = scalar_lea.sflag [#allocation8], %s551_s28 }
  0xe8   : > { %2616 = dma.done.wait (%p3357_p3), %s552_s17, 256  }
  0xe9   : > { %2618 = vsyncadd (%p3357_p3), %s552_s17, 4294967040  ;;  %s564_s12 = scalar_lea.vmem [#allocation9], %s3047_s10  ;;  %p3358_p6 = scmp.eq.s32.totalorder %s2776_s27, 0 }
  0xeb   : > { %2620 = dma.done.wait (%p3358_p6), [#allocation11], 1024   ;;  %p3359_p0 = pmov %p3358_p6 }
  0xed   : > { %2622 = vsyncadd (%p3359_p0), [#allocation11], 4294966272  ;;  %p3360_p4 = pmov %p3359_p0 }
  0xee   : > { %p3361_p10 = pmov %p3359_p0 }
  0xef   : > { %2624 = dma.done.wait (%p3360_p4), [#allocation14], 528  }
  0xf0   : > { %2626 = vsyncadd (%p3361_p10), [#allocation14], 4294966768  ;;  %vm664_vm0 = vcmask 261120   ;;  %v2668_v0 = vmov 0.0|0.0   ;;  %v2669_v1 = vmov 0.0   ;;  %vm2670_vm1 = vmmov 0  }
  0xf1   : > { %2165 = vmatprep.subr.bf16.mxu1 %v2668_v0  ;;  %2159 = vmatprep.subr.bf16.mxu0 %v2668_v0  ;;  %665 = vst.msk [vmem:[#allocation3] sm:$0xff] %vm664_vm0, %v2669_v1  ;;  %v754_v2 = vld [vmem:[#allocation12] sm:$0xff]  ;;  %v755_v3 = vld [vmem:[#allocation12 + $0x8] sm:$0xff]  ;;  %v756_v7 = vld [vmem:[#allocation12 + $0x10] sm:$0xff]  ;;  %vm922_vm2 = vcmask 64512   ;;  %s2671_s26 = smov 120  }
  0xf2   : > { %2094 = vmatprep.mubr.msk.f32.mxu1 %vm2670_vm1, %v2669_v1  ;;  %2083 = vmatprep.mubr.msk.f32.mxu0 %vm2670_vm1, %v2669_v1  ;;  %v669_v4 = vld [vmem:[#allocation10] sm:$0xff]  ;;  %v2166_v5 = vpack.c.bf16 %v755_v3, %v754_v2  ;;  %v670_v6 = vld [vmem:[#allocation10 + $0x8] sm:$0xff]  ;;  %v757_v8 = vld [vmem:[#allocation12 + $0x18] sm:$0xff]  ;;  %s2672_s3 = smov 112   ;;  %s2673_s21 = smov 104   ;;  %vm1259_vm3 = vcmask 130112  }
  0xf3   : > { %v2160_v9 = vpack.c.bf16 %v670_v6, %v669_v4  ;;  %v671_v10 = vld [vmem:[#allocation10 + $0x10] sm:$0xff]  ;;  %v672_v11 = vld [vmem:[#allocation10 + $0x18] sm:$0xff]  ;;  %v2169_v12 = vpack.c.bf16 %v757_v8, %v756_v7  ;;  %v667_v14 = vld [vmem:[%s555_s19] sm:$0xff]  ;;  %s2007_s16 = sshll.u32 %s3044_s25, 5  ;;  %s3362_s15 = sld [smem:[#allocation36_spill]]  ;;  %vm1433_vm4 = vcmask 195712  }
  0xf4   : > { %2167 = vmatpush3.bf16.msra.mxu1 %v2166_v5  ;;  %v2163_v13 = vpack.c.bf16 %v672_v11, %v671_v10  ;;  %v666_v15 = vld [vmem:[%s546_s7] sm:$0xff]  ;;  %v2010_v16 = vld [vmem:[%s3287_s6] ss:$0 sm:$0xff]  ;;  %v839_v25 = vld [vmem:[#allocation13 + $0x8] sm:$0xff]  ;;  %s3133_s30 = scalar_lea.vmem [#allocation17], %s2007_s16  ;;  %s2674_s17 = smov 8  }
  0xf5   : > { %2161 = vmatpush3.bf16.msra.mxu0 %v2160_v9  ;;  %2168 = vmatprep.subr.bf16.mxu1 %v2668_v0  ;;  %v2008_v17 = vld [vmem:[%s3285_s4] ss:$0 sm:$0xff]  ;;  %v840_v26 = vld [vmem:[#allocation13 + $0x10] sm:$0xff]  ;;  %v841_v28 = vld [vmem:[#allocation13 + $0x18] sm:$0xff]  ;;  %s2675_s19 = smov 16   ;;  %s2676_s27 = smov 24  }
  0xf6   : > { %2162 = vmatprep.subr.bf16.mxu0 %v2668_v0  ;;  %v838_v24 = vld [vmem:[#allocation13] sm:$0xff]  ;;  %v2175_v29 = vpack.c.bf16 %v841_v28, %v840_v26  ;;  %v668_v30 = vld [vmem:[%s564_s12] sm:$0xff]  ;;  %s3363_s12 = sld [smem:[#allocation26_spill]]  ;;  %s3364_s20 = sld [smem:[#allocation30_spill]]  ;;  %vm1607_vm5 = vcmask 261312  }
  0xf7   : > { %v2172_v27 = vpack.c.bf16 %v839_v25, %v838_v24  ;;  %v2012_v39 = vld [vmem:[#allocation15] ss:$0 sm:$0xff]  ;;  %s1737_s18 = sshll.u32 %s3133_s30, 4  ;;  %s1709_s29 = scalar_lea.sflag [#allocation18], %s3044_s25  ;;  %s3195_s18 = int_to_ptr.vmem [resolvable:$true] %s1737_s18 }
  0xf8   : > { %2170 = vmatpush3.bf16.msra.mxu1 %v2169_v12  ;;  %s2531_s24 = scalar_lea.vmem %s3195_s18, 512  ;;  %s2677_s13 = smov [#allocation17]  }
  0xf9   : > { %2164 = vmatpush3.bf16.msra.mxu0 %v2163_v13  ;;  %2108 = vmatprep.subr.mxu1 %v2669_v1  ;;  %v1611_v28 = vld [vmem:[%s3362_s15] sm:$0xff]  ;;  %p2532_p13 = scmp.ne.s32.totalorder %s3195_s18, %s2531_s24  ;;  %s2535_s1 = sshll.u32 %s2677_s13, 4  ;;  %s2536_s1 = int_to_ptr.vmem [resolvable:$false] %s2535_s1 }
  0xfa   : > { %2171 = vmatprep.subr.bf16.mxu0 %v2668_v0  ;;  %p2538_p8 = scmp.lt.s32.totalorder %s3195_s18, %s2536_s1 }
  0xfb   : > { %2095 = vmatmul.mubr.msk.f32.vlgmr.msra.gmra.mrb[0].mxu1 %vm664_vm0, %v667_v14 }
  0xfc   : > { %2084 = vmatmul.mubr.msk.f32.vlgmr.msra.gmra.mrb[0].mxu0 %vm664_vm0, %v666_v15  ;;  %2110 = vmatprep.mubr.msk.f32.mxu1 %vm2670_vm1, %v2669_v1  ;;  %s2038_s11 = sshll.u32 %s3363_s12, 9  ;;  %p3367_p2 = scmp.ne.s32.totalorder %s3364_s20, 0 }
  0xfd   : > { %2105 = vmatprep.mubr.msk.f32.mxu0 %vm2670_vm1, %v2669_v1  ;;  %2173 = vmatpush3.bf16.msra.mxu0 %v2172_v27 }
  0xfe   : > { %2174 = vmatprep.subr.bf16.mxu0 %v2668_v0  ;;  %p2533_p1 = pnand %p2532_p13, %p3367_p2 }
 0x100   : > { %p2534_p12 = pneg %p2533_p1 }
 0x101   : > { %2176 = vmatpush3.bf16.msra.mxu0 %v2175_v29  ;;  %v1612_v29 = vld [vmem:[%s3362_s15 + $0x8] sm:$0xff] }
 0x102   : > { %2128 = vmatprep.subr.mxu0 %v2669_v1 }
 0x104   : > { %2106 = vmatmul.mubr.msk.f32.vlgmr.msra.gmra.mrb[2].mxu0 %vm664_vm0, %v668_v30  ;;  %v2178_v30 = vpack.c.bf16 %v1612_v29, %v1611_v28 }
 0x105   : > { %2130 = vmatprep.mubr.msk.f32.mxu0 %vm2670_vm1, %v2669_v1 }
 0x1ce   : > { %v834_v18 = vpop.f32.mrb[0].mxu1 }
 0x1cf   : > { %v835_v19 = vadd.f32 %v2010_v16, %v834_v18  ;;  %v2096_v20 = vpop.f32.mrb[1].mxu1  ;;  %v750_v21 = vpop.f32.mrb[0].mxu0 }
 0x1d0   : > { %v751_v22 = vadd.f32 %v2008_v17, %v750_v21  ;;  %v2085_v23 = vpop.f32.mrb[1].mxu0 }
 0x1d1   : > { %1088 = vrot.lane.b32.xlu1 %v835_v19, %s2671_s26  ;;  %2109 = vmatpush3.xpose.msk.msra.mxu1 %vm922_vm2, %v835_v19 }
 0x1d2   : > { %2113 = vmatprep.subr.mxu1 %v2669_v1 }
 0x1d4   : > { %2111 = vmatmul.mubr.msk.f32.vlgmr.msra.gmra.mrb[2].mxu1 %vm922_vm2, %v751_v22 }
 0x1d5   : > { %1086 = vrot.lane.b32.xlu1 %v751_v22, %s2671_s26  ;;  %2115 = vmatprep.mubr.msk.f32.mxu1 %vm2670_vm1, %v2669_v1 }
 0x1d7   : > { %v918_v40 = vpop.f32.mrb[2].mxu0 }
 0x1d8   : > { %v3117_v41 = vadd.f32 %v2012_v39, %v918_v40  ;;  %v2107_v42 = vpop.f32.mrb[3].mxu0 }
 0x1d9   : > { %1261 = vrot.lane.b32.xlu1 %v751_v22, %s2672_s3 }
 0x1da   : > { %2114 = vmatpush3.msra.mxu1 %v3117_v41 }
 0x1db   : > { %2118 = vmatprep.subr.mxu1 %v2669_v1 }
 0x1dd   : > { %1437 = vrot.lane.b32.xlu1 %v835_v19, %s2673_s21 }
 0x1e1   : > { %1435 = vrot.lane.b32.xlu1 %v751_v22, %s2673_s21 }
 0x243   : > { %v1089_v43 = vpop.permute.xlu1 %1088 }
 0x247   : > { %v1087_v44 = vpop.permute.xlu1 %1086 }
 0x24b   : > { %v1262_v45 = vpop.permute.xlu1 %1261 }
 0x24f   : > { %v1438_v48 = vpop.permute.xlu1 %1437 }
 0x253   : > { %v1436_v50 = vpop.permute.xlu1 %1435 }
 0x2a7   : > { %v995_v31 = vpop.f32.mrb[2].mxu1 }
 0x2a8   : > { %v2112_v32 = vpop.f32.mrb[3].mxu1  ;;  %v999_v33 = vsel %vm922_vm2, %v995_v31, -inf }
 0x2a9   : > { %1000 = vmax.xlane.f32.xlu0 %v999_v33  ;;  %v1614_v32 = vld [vmem:[%s3362_s15 + $0x18] sm:$0xff] }
 0x336   : > { %v1001_v34 = vpop.xlane.xlu0 %1000 }
 0x337   : > { %v1002_v35 = vsub.f32 %v995_v31, %v1001_v34  ;;  %v1613_v31 = vld [vmem:[%s3362_s15 + $0x10] sm:$0xff] }
 0x339   : > { %v1003_v36 = vmul.f32 1.442695, %v1002_v35 }
 0x33b   : > { %2313 = vpow2.f32 %v1003_v36 }
 0x345   : > { %v2314_v37 = vpop.eup %2313 }
 0x346   : > { %v1005_v38 = vsel %vm922_vm2, %v2314_v37, 0.0 }
 0x347   : > { %1006 = vadd.xlane.f32.xlu0 %v1005_v38 }
 0x35d   : > { %1263 = vrot.lane.b32.xlu0 %v835_v19, %s2672_s3 }
 0x3d4   : > { %v1007_v46 = vpop.xlane.xlu0 %1006 }
 0x3d5   : > { %2315 = vrcp.f32 %v1007_v46 }
 0x3d8   : > { %v1264_v47 = vpop.permute.xlu0 %1263 }
 0x3d9   : > { %2129 = vmatpush3.xpose.msk.msra.mxu0 %vm922_vm2, %v1264_v47 }
 0x3da   : > { %2138 = vmatprep.subr.mxu0 %v2669_v1 }
 0x3dc   : > { %2131 = vmatmul.mubr.msk.f32.vlgmr.msra.gmra.mrb[4].mxu0 %vm922_vm2, %v1262_v45 }
 0x3dd   : > { %2139 = vmatpush3.xpose.msk.msra.mxu0 %vm922_vm2, %v1438_v48  ;;  %2140 = vmatprep.mubr.msk.f32.mxu0 %vm2670_vm1, %v2669_v1 }
 0x3de   : > { %2177 = vmatprep.subr.bf16.mxu0 %v2668_v0 }
 0x3df   : > { %v2316_v49 = vpop.eup %2315 }
 0x3e0   : > { %v1010_v51 = vmul.f32 %v2316_v49, %v2314_v37  ;;  %2141 = vmatmul.mubr.msk.f32.vlgmr.msra.gmra.mrb[6].mxu0 %vm922_vm2, %v1436_v50 }
 0x3e1   : > { %2156 = vmatprep.mubr.msk.f32.mxu0 %vm2670_vm1, %v2669_v1  ;;  %2179 = vmatpush3.bf16.msra.mxu0 %v2178_v30 }
 0x3e2   : > { %1011 = vst.msk [vmem:[%s3133_s30] sm:$0xff] %vm922_vm2, %v1010_v51  ;;  %2116 = vmatmul.mubr.msk.f32.vlgmr.msra.gmra.mrb[4].mxu1 %vm922_vm2, %v1010_v51  ;;  %2180 = vmatprep.subr.bf16.mxu0 %v2668_v0 }
 0x3e3   : > { %2119 = vmatpush3.xpose.msk.msra.mxu1 %vm922_vm2, %v1089_v43  ;;  %2120 = vmatprep.mubr.msk.f32.mxu1 %vm2670_vm1, %v2669_v1 }
 0x3e4   : > { %2123 = vmatprep.subr.mxu1 %v2669_v1 }
 0x3e6   : > { %2121 = vmatmul.mubr.msk.f32.vlgmr.msra.gmra.mrb[6].mxu1 %vm922_vm2, %v1087_v44 }
 0x3e7   : > { %2125 = vmatprep.mubr.msk.f32.mxu1 %vm2670_vm1, %v2669_v1 }
 0x4af   : > { %v1335_v52 = vpop.f32.mrb[4].mxu0 }
 0x4b0   : > { %v2132_v53 = vpop.f32.mrb[5].mxu0  ;;  %v1339_v54 = vsel %vm922_vm2, %v1335_v52, -inf }
 0x4b1   : > { %1340 = vmax.xlane.f32.xlu0 %v1339_v54 }
 0x4b3   : > { %v1509_v55 = vpop.f32.mrb[6].mxu0 }
 0x4b4   : > { %v2142_v56 = vpop.f32.mrb[7].mxu0  ;;  %v1513_v62 = vsel %vm922_vm2, %v1509_v55, -inf }
 0x4b5   : > { %v1081_v57 = vpop.f32.mrb[4].mxu1 }
 0x4b6   : > { %1085 = vst.msk [vmem:[#allocation2] sm:$0xff] %vm922_vm2, %v1081_v57  ;;  %v2117_v58 = vpop.f32.mrb[5].mxu1 }
 0x4b9   : > { %v1160_v59 = vpop.f32.mrb[6].mxu1 }
 0x4ba   : > { %v2122_v60 = vpop.f32.mrb[7].mxu1  ;;  %v1164_v61 = vsel %vm922_vm2, %v1160_v59, -inf }
 0x4bb   : > { %1165 = vmax.xlane.f32.xlu1 %v1164_v61 }
 0x4bf   : > { %1514 = vmax.xlane.f32.xlu1 %v1513_v62 }
 0x53e   : > { %v1341_v63 = vpop.xlane.xlu0 %1340 }
 0x53f   : > { %v1342_v2 = vsub.f32 %v1335_v52, %v1341_v63 }
 0x541   : > { %v1343_v3 = vmul.f32 1.442695, %v1342_v2 }
 0x543   : > { %2317 = vpow2.f32 %v1343_v3 }
 0x548   : > { %v1166_v4 = vpop.xlane.xlu1 %1165 }
 0x549   : > { %v1167_v12 = vsub.f32 %v1160_v59, %v1166_v4 }
 0x54b   : > { %v1168_v13 = vmul.f32 1.442695, %v1167_v12 }
 0x54c   : > { %v1515_v5 = vpop.xlane.xlu1 %1514 }
 0x54d   : > { %v2318_v6 = vpop.eup %2317  ;;  %v1516_v7 = vsub.f32 %v1509_v55, %v1515_v5 }
 0x54e   : > { %v1345_v8 = vsel %vm922_vm2, %v2318_v6, 0.0 }
 0x54f   : > { %v1517_v9 = vmul.f32 1.442695, %v1516_v7  ;;  %1346 = vadd.xlane.f32.xlu0 %v1345_v8 }
 0x551   : > { %2319 = vpow2.f32 %v1517_v9 }
 0x552   : > { %2321 = vpow2.f32 %v1168_v13 }
 0x55b   : > { %v2320_v10 = vpop.eup %2319 }
 0x55c   : > { %v1519_v11 = vsel %vm922_vm2, %v2320_v10, 0.0  ;;  %v2322_v14 = vpop.eup %2321 }
 0x55d   : > { %1520 = vadd.xlane.f32.xlu1 %v1519_v11  ;;  %v1170_v15 = vsel %vm922_vm2, %v2322_v14, 0.0 }
 0x565   : > { %1179 = vrot.lane.b32.xlu0 %v3117_v41, %s2671_s26 }
 0x56e   : > { %1353 = vrot.lane.b32.xlu1 %v3117_v41, %s2672_s3 }
 0x592   : > { %1171 = vadd.xlane.f32.xlu1 %v1170_v15 }
 0x5a3   : > { %1527 = vrot.lane.b32.xlu1 %v3117_v41, %s2673_s21  ;;  %s3365_s21 = sld [smem:[#allocation39_spill]] }
 0x5a9   : > { %s3366_s16 = smov %s3365_s21  ;;  %s3193_s9 = scalar_lea.hbm %s3365_s21, %s2038_s11 }
 0x5dc   : > { %v1347_v16 = vpop.xlane.xlu0 %1346 }
 0x5dd   : > { %2323 = vrcp.f32 %v1347_v16 }
 0x5e0   : > { %v1180_v17 = vpop.permute.xlu0 %1179 }
 0x5e1   : > { %2124 = vmatpush3.msra.mxu1 %v1180_v17 }
 0x5e2   : > { %2133 = vmatprep.subr.mxu1 %v2669_v1 }
 0x5e7   : > { %v2324_v18 = vpop.eup %2323 }
 0x5e8   : > { %v1350_v19 = vmul.f32 %v2324_v18, %v2318_v6 }
 0x5ea   : > { %2023 = vst.msk [vmem:[%s3133_s30 + $0x10] sm:$0xff] %vm922_vm2, %v1350_v19  ;;  %v1521_v20 = vpop.xlane.xlu1 %1520 }
 0x5eb   : > { %2325 = vrcp.f32 %v1521_v20 }
 0x5ee   : > { %v1354_v23 = vpop.permute.xlu1 %1353 }
 0x5f5   : > { %v2326_v21 = vpop.eup %2325 }
 0x5f6   : > { %v1524_v22 = vmul.f32 %v2326_v21, %v2320_v10 }
 0x5f8   : > { %2027 = vst.msk [vmem:[%s3133_s30 + $0x18] sm:$0xff] %vm922_vm2, %v1524_v22 }
 0x61f   : > { %v1172_v24 = vpop.xlane.xlu1 %1171 }
 0x620   : > { %2327 = vrcp.f32 %v1172_v24 }
 0x623   : > { %v1528_v27 = vpop.permute.xlu1 %1527 }
 0x62a   : > { %v2328_v25 = vpop.eup %2327 }
 0x62b   : > { %v1175_v26 = vmul.f32 %v2328_v25, %v2322_v14 }
 0x62d   : > { %2019 = vst.msk [vmem:[%s3133_s30 + $0x8] sm:$0xff] %vm922_vm2, %v1175_v26  ;;  %2126 = vmatmul.mubr.msk.f32.vlgmr.msra.gmra.mrb[8].mxu1 %vm922_vm2, %v1175_v26  ;;  %s2537_s30 = scalar_lea.vmem %s2536_s1, 1024 }
 0x62e   : > { %2134 = vmatpush3.msra.mxu1 %v1354_v23  ;;  %2135 = vmatprep.mubr.msk.f32.mxu1 %vm2670_vm1, %v2669_v1  ;;  %p2539_p9 = scmp.lt.s32.totalorder %s2537_s30, %s2531_s24 }
 0x62f   : > { %2143 = vmatprep.subr.mxu1 %v2669_v1 }
 0x630   : > { %p2540_p7 = por %p2539_p9, %p2538_p8 }
 0x631   : > { %2136 = vmatmul.mubr.msk.f32.vlgmr.msra.gmra.mrb[10].mxu1 %vm922_vm2, %v1350_v19 }
 0x632   : > { %2144 = vmatpush3.msra.mxu1 %v1528_v27  ;;  %2145 = vmatprep.mubr.msk.f32.mxu1 %vm2670_vm1, %v2669_v1  ;;  %v2181_v1 = vpack.c.bf16 %v1614_v32, %v1613_v31  ;;  %p2541_p11 = pnand %p2540_p7, %p2534_p12 }
 0x634   : > { %2182 = vmatpush3.bf16.msra.mxu0 %v2181_v1 }
 0x635   : > { %2146 = vmatmul.mubr.msk.f32.vlgmr.msra.gmra.mrb[12].mxu1 %vm922_vm2, %v1524_v22 }
 0x700   : > { %v1251_v33 = vpop.f32.mrb[8].mxu1 }
 0x701   : > { %1256 = vrot.lane.b32.xlu0 %v1251_v33, %s2674_s17  ;;  %v2127_v34 = vpop.f32.mrb[9].mxu1 }
 0x704   : > { %v1425_v35 = vpop.f32.mrb[10].mxu1 }
 0x705   : > { %1430 = vrot.lane.b32.xlu1 %v1425_v35, %s2675_s19  ;;  %v2137_v36 = vpop.f32.mrb[11].mxu1 }
 0x708   : > { %v1599_v37 = vpop.f32.mrb[12].mxu1 }
 0x709   : > { %1604 = vrot.lane.b32.xlu0 %v1599_v37, %s2676_s27  ;;  %v2147_v38 = vpop.f32.mrb[13].mxu1 }
 0x773   : > { %v1257_v39 = vpop.permute.xlu0 %1256 }
 0x774   : > { %1260 = vst.msk [vmem:[#allocation2] sm:$0xff] %vm1259_vm3, %v1257_v39 }
 0x777   : > { %v1431_v0 = vpop.permute.xlu1 %1430 }
 0x778   : > { %1434 = vst.msk [vmem:[#allocation2] sm:$0xff] %vm1433_vm4, %v1431_v0 }
 0x77b   : > { %v1605_v40 = vpop.permute.xlu0 %1604 }
 0x77c   : > { %1608 = vst.msk [vmem:[#allocation2] sm:$0xff] %vm1607_vm5, %v1605_v40 }
 0x783   : > { %v1610_v41 = vld [vmem:[#allocation2] sm:$0xff] }
 0x784   : > { %2157 = vmatmul.mubr.msk.f32.vlgmr.msra.gmra.mrb[8].mxu0 %vm664_vm0, %v1610_v41 }
 0x785   : > { %2544 = shalt.err (!%p2541_p11)
}
 0x786   : > { %s2545_s14 = scalar_lea.hbm %s3193_s9, 512  ;;  %s2549_s19 = scalar_lea.hbm %s3366_s16, 1024 }
 0x787   : > { %p2546_p5 = scmp.ne.s32.totalorder %s3193_s9, %s2545_s14  ;;  %p2550_p0 = scmp.lt.u32.totalorder %s3193_s9, %s3366_s16 }
 0x788   : > { %p2551_p4 = scmp.lt.u32.totalorder %s2549_s19, %s2545_s14  ;;  %p2553_p13 = scmp.lt.u32.totalorder %s2545_s14, %s3193_s9 }
 0x789   : > { %p2547_p3 = pnand %p2546_p5, %p3367_p2 }
 0x78a   : > { %p2552_p10 = por %p2551_p4, %p2550_p0 }
 0x78b   : > { %p2548_p6 = pneg %p2547_p3 }
 0x78c   : > { %p2554_p1 = por %p2553_p13, %p2552_p10 }
 0x78e   : > { %p2555_p12 = pnand %p2554_p1, %p2548_p6 }
 0x790   : > { %2558 = shalt.err (!%p2555_p12)
}
 0x791   : > { %s2678_s26 = smov 128   ;;  %v1609_v42 = vld [vmem:[#allocation3] sm:$0xff]  ;;  %s3368_s24 = sld [smem:[#allocation37_spill]] }
 0x792   : > { %2206 = dma.vmem_to_hbm [thread:$0]  (%p3367_p2), %s3195_s18, 512, %s3193_s9, %s1709_s29, %s2678_s26, %s2678_s26, %s2674_s17  }
 0x793   : > { %s2033_s13 = sshll.u32 %s3363_s12, 7  ;;  %s639_s1 = scalar_lea.vmem [#allocation16], %s3047_s10 }
 0x794   : > { %s1722_s30 = sshll.u32 %s639_s1, 4  ;;  %s3369_s28 = sld [smem:[#allocation38_spill]]  ;;  %s3233_s30 = int_to_ptr.vmem [resolvable:$true] %s1722_s30 }
 0x795   : > { %s1704_s18 = scalar_lea.sflag [#allocation6], %s3044_s25  ;;  %s2559_s9 = scalar_lea.vmem %s3233_s30, 128 }
 0x796   : > { %p2560_p8 = scmp.ne.s32.totalorder %s3233_s30, %s2559_s9  ;;  %s2679_s10 = smov [#allocation16]  }
 0x797   : > { %v2030_v46 = vld [vmem:[%s3368_s24] ss:$0 sm:$0xff]  ;;  %s2563_s12 = sshll.u32 %s2679_s10, 4  ;;  %s2564_s12 = int_to_ptr.vmem [resolvable:$false] %s2563_s12 }
 0x798   : > { %p2561_p9 = pnand %p2560_p8, %p3367_p2  ;;  %s2565_s29 = scalar_lea.vmem %s2564_s12, 256 }
 0x799   : > { %p2566_p11 = scmp.lt.s32.totalorder %s3233_s30, %s2564_s12  ;;  %p2567_p5 = scmp.lt.s32.totalorder %s2565_s29, %s2559_s9 }
 0x79a   : > { %s3231_s17 = scalar_lea.hbm %s3369_s28, %s2033_s13  ;;  %p2562_p7 = pneg %p2561_p9 }
 0x79b   : > { %p2568_p3 = por %p2567_p5, %p2566_p11 }
 0x79d   : > { %p2569_p6 = pnand %p2568_p3, %p2562_p7 }
 0x857   : > { %v1684_v43 = vpop.f32.mrb[8].mxu0 }
 0x858   : > { %v1688_v44 = vadd.f32 %v1684_v43, %v1609_v42  ;;  %v2158_v45 = vpop.f32.mrb[9].mxu0 }
 0x85a   : > { %1689 = vst.msk [vmem:[#allocation3] sm:$0xff] %vm664_vm0, %v1688_v44 }
 0x861   : > { %v1693_v47 = vld [vmem:[#allocation3] sm:$0xff] }
 0x862   : > { %v1701_v48 = vadd.f32 %v2030_v46, %v1693_v47 }
 0x864   : > { %1702 = vst.msk [vmem:[%s639_s1] sm:$0xff] %vm664_vm0, %v1701_v48 }
 0x865   : > { %2572 = shalt.err (!%p2569_p6)
}
 0x866   : > { %s2573_s25 = scalar_lea.hbm %s3231_s17, 128  ;;  %s2577_s11 = scalar_lea.hbm %s3369_s28, 256 }
 0x867   : > { %p2574_p0 = scmp.ne.s32.totalorder %s3231_s17, %s2573_s25  ;;  %p2578_p13 = scmp.lt.u32.totalorder %s3231_s17, %s3369_s28 }
 0x868   : > { %p2579_p1 = scmp.lt.u32.totalorder %s2577_s11, %s2573_s25  ;;  %p2581_p8 = scmp.lt.u32.totalorder %s2573_s25, %s3231_s17 }
 0x869   : > { %p2575_p4 = pnand %p2574_p0, %p3367_p2 }
 0x86a   : > { %p2580_p12 = por %p2579_p1, %p2578_p13 }
 0x86b   : > { %p2576_p10 = pneg %p2575_p4 }
 0x86c   : > { %p2582_p9 = por %p2581_p8, %p2580_p12 }
 0x86e   : > { %p2583_p7 = pnand %p2582_p9, %p2576_p10 }
 0x870   : > { %2586 = shalt.err (!%p2583_p7)
}
 0x871   : > { %2205 = dma.vmem_to_hbm [thread:$0]  (%p3367_p2), %s3233_s30, 128, %s3231_s17, %s1704_s18  }
 0x872 PF: > { %s3370_s21 = sld [smem:[#allocation25_spill]]  ;;  %s3371_s24 = sld [smem:[#allocation32_spill]] }
 0x873   : > { %s3372_s13 = sld [smem:[#allocation28_spill]] }
 0x878   : > { %s1752_s1 = sand.u32 1, %s3370_s21   ;;  %p3373_p11 = scmp.ne.s32.totalorder %s3371_s24, 0 }
 0x879   : > { %p3374_p5 = scmp.ge.s32.totalorder %s3372_s13, 2  ;;  %s1753_s14 = scalar_lea.sflag [#allocation6], %s1752_s1 }
 0x87b   : > { %p2233_p3 = pnand %p3374_p5, %p3373_p11 }
 0x87d   : > { %2628 = dma.done.wait (!%p2233_p3), %s1753_s14, 128  }
 0x87e   : > { %2630 = vsyncadd (!%p2233_p3), %s1753_s14, 4294967168  ;;  %s1762_s7 = scalar_lea.sflag [#allocation18], %s1752_s1 }
 0x87f   : > { %2632 = dma.done.wait (!%p2233_p3), %s1762_s7, 512  }
 0x880   : > { %2634 = vsyncadd (!%p2233_p3), %s1762_s7, 4294966784  ;;  %s37_s26 = sadd.s32 1, %s3372_s13   ;;  %s3375_s20 = sld [smem:[#allocation31_spill]] }
 0x881   : > { %p34_p6 = scmp.ge.s32.totalorder %s37_s26, 4   ;;  %s3376_s24 = sld [smem:[#allocation27_spill]] }
 0x882   : > { %s3377_s25 = sld [smem:[#allocation29_spill]]  ;;  %s3378_s21 = smov %s2641_s22 }
 0x883   : > { %s3379_s22 = smov %s2645_s23  ;;  %36 = sbr.rel (!%p34_p6) target bundleno = 20 (0x14), region = 190 }
 0x886   : > { %s3380_s23 = smov %s3375_s20 }
 0x88a   :  { %1767 = vsyncpa [#allocation5], 1 }
 0x88b   :  { %1769 = vsyncpa [#allocation5 + $0x1], 1 }
 0x88c   :  { %1770 = vsyncpa [#allocation8], 1 }
 0x88d   :  { %1772 = vsyncpa [#allocation8 + $0x1], 1 }
 0x88e   :  { %1773 = vsyncpa [#allocation11], 1 }
 0x88f   :  { %1774 = vsyncpa [#allocation14], 1 }
 0x890   :  { %1775 = vsyncpa [#allocation6], 1 }
 0x891   :  { %1777 = vsyncpa [#allocation6 + $0x1], 1 }
 0x892   :  { %1778 = vsyncpa [#allocation18], 1 }
 0x893   :  { %1780 = vsyncpa [#allocation18 + $0x1], 1 }

</bundles_post_ra>
